<compile_context>
chip_gen: v7x
topology: tpu7x:2x2x1
jax: 0.10.0
libtpu: 0.0.40
codegen_flags: <defaults>
</compile_context>

<pallas_src>
import math
from functools import partial

import jax
import jax.numpy as jnp
from jax.experimental import pallas as pl
from jax.experimental.pallas import tpu as pltpu


def _round_up(x, m):
    return (x + m - 1) // m * m


def encoder_layer_kernel(
    x_ref,      # (1, S, D)   fp32, full sequence for this batch element
    wq_ref,     # (D, D)      bf16, Q projection, 1/sqrt(hd) folded in
    bq_ref,     # (1, D)      fp32
    wkv_ref,    # (D, 2D)     bf16, per-head [k_h | v_h] column blocks
    bkv_ref,    # (1, 2D)     fp32
    wo_ref,     # (D, D)      bf16, out_proj.weight^T
    bo_ref,     # (1, D)      fp32
    n1_ref,     # (1, D)      fp32
    n2_ref,     # (1, D)      fp32
    w13_ref,    # (D, 2*Hp)   bf16, fused [w1 | w3], zero-padded to Hp
    w2_ref,     # (Hp, D)     bf16, zero-padded rows
    o_ref,      # (1, TQ, D)
    kv_ref,     # VMEM scratch (S, 2D) bf16 — persists across q-tile grid steps
    *,
    nhead: int,
    hidden_pad: int,
    eps: float,
    tq: int,
):
    f32 = jnp.float32
    cdt = wq_ref.dtype                    # MXU operand dtype (bf16)
    D = x_ref.shape[-1]
    hd = D // nhead
    Hp = hidden_pad
    qi = pl.program_id(1)

    def rmsnorm(v, w_ref):
        return v * jax.lax.rsqrt(jnp.mean(v * v, axis=-1, keepdims=True) + eps) * w_ref[...]

    # ---- K/V projection for the WHOLE sequence, once per batch element -------
    @pl.when(qi == 0)
    def _():
        xf = x_ref[0].astype(f32)                                   # (S, D)
        xfn = rmsnorm(xf, n1_ref)
        kv = jnp.dot(xfn.astype(cdt), wkv_ref[...],
                     preferred_element_type=f32) + bkv_ref[...]     # (S, 2D)
        kv_ref[...] = kv.astype(cdt)

    # ---- this query tile ------------------------------------------------------
    row0 = pl.multiple_of(qi * tq, tq)
    xq = x_ref[0, pl.ds(row0, tq), :].astype(f32)                   # (TQ, D)
    xqn = rmsnorm(xq, n1_ref)
    q = jnp.dot(xqn.astype(cdt), wq_ref[...],
                preferred_element_type=f32) + bq_ref[...]           # (TQ, D)

    # ---- per-head attention; out-projection fused into the head loop ----------
    # No transposes / concats: q, k, v are static lane slices; ctx_h is consumed
    # in place by an (hd, D) slab of the out-projection and accumulated.
    attn = jnp.zeros((tq, D), f32)
    for h in range(nhead):
        qh = q[:, h * hd:(h + 1) * hd].astype(cdt)                  # (TQ, hd)
        kh = kv_ref[:, 2 * h * hd:(2 * h + 1) * hd]                 # (S, hd) bf16
        vh = kv_ref[:, (2 * h + 1) * hd:(2 * h + 2) * hd]           # (S, hd) bf16
        s = jnp.einsum("qd,kd->qk", qh, kh,
                       preferred_element_type=f32)                  # (TQ, S)
        s = s - jnp.max(s, axis=-1, keepdims=True)
        p = jnp.exp(s)
        p = p * pl.reciprocal(jnp.sum(p, axis=-1, keepdims=True), approx=True)
        ctx = jnp.dot(p.astype(cdt), vh, preferred_element_type=f32)        # (TQ, hd)
        attn = attn + jnp.dot(ctx.astype(cdt), wo_ref[h * hd:(h + 1) * hd, :],
                              preferred_element_type=f32)
    attn = attn + bo_ref[...]

    # ---- residual 1 (dropout1 = identity in eval) ------------------------------
    x1 = xq + attn

    # ---- RMSNorm 2 + SwiGLU FFN (lane-aligned padded hidden) -------------------
    xn2 = rmsnorm(x1, n2_ref)
    h13 = jnp.dot(xn2.astype(cdt), w13_ref[...], preferred_element_type=f32)  # (TQ, 2Hp)
    h1 = h13[:, :Hp]
    h3 = h13[:, Hp:]
    gated = (h1 * jax.nn.sigmoid(h1)) * h3
    ff = jnp.dot(gated.astype(cdt), w2_ref[...], preferred_element_type=f32)  # (TQ, D)

    # ---- residual 2 (dropout2 = identity in eval) -------------------------------
    o_ref[0] = (x1 + ff).astype(o_ref.dtype)


def prepare_weights(params, *, nhead: int, compute_dtype=jnp.bfloat16):
    """One-time host-side weight prep. Cache the result and reuse across calls."""
    D = params["out_proj_w"].shape[0]
    H = params["w1"].shape[0]
    hd = D // nhead
    Hp = _round_up(H, 128)
    scale = 1.0 / math.sqrt(hd)

    ipw = params["in_proj_w"]                    # (3D, D) torch (out, in)
    ipb = params["in_proj_b"]                    # (1, 3D)

    # Q: fold 1/sqrt(hd); natural column order is already head-major (h*hd ..).
    wq = (ipw[0:D] * scale).T.astype(compute_dtype)                 # (D, D)
    bq = (ipb[:, 0:D] * scale).astype(jnp.float32)                  # (1, D)

    # K/V reordered to per-head [k_h | v_h] lane blocks.
    wk = ipw[D:2 * D].T.reshape(D, nhead, hd)
    wv = ipw[2 * D:3 * D].T.reshape(D, nhead, hd)
    wkv = jnp.stack([wk, wv], axis=2).reshape(D, 2 * D).astype(compute_dtype)
    bk = ipb[0, D:2 * D].reshape(nhead, hd)
    bv = ipb[0, 2 * D:3 * D].reshape(nhead, hd)
    bkv = jnp.stack([bk, bv], axis=1).reshape(1, 2 * D).astype(jnp.float32)

    wo = params["out_proj_w"].T.astype(compute_dtype)               # (D, D)
    bo = params["out_proj_b"].astype(jnp.float32)                   # (1, D)

    # SwiGLU: fuse [w1 | w3], zero-pad hidden dim to a multiple of 128.
    pad_cols = ((0, 0), (0, Hp - H))
    w1p = jnp.pad(params["w1"].T, pad_cols)
    w3p = jnp.pad(params["w3"].T, pad_cols)
    w13 = jnp.concatenate([w1p, w3p], axis=1).astype(compute_dtype)  # (D, 2Hp)
    w2p = jnp.pad(params["w2"].T, ((0, Hp - H), (0, 0))).astype(compute_dtype)  # (Hp, D)

    return dict(
        wq=wq, bq=bq, wkv=wkv, bkv=bkv, wo=wo, bo=bo,
        n1=params["norm1_w"].astype(jnp.float32),
        n2=params["norm2_w"].astype(jnp.float32),
        w13=w13, w2=w2p, hidden_pad=Hp,
    )


def replica_transformer_encoder_layer(x, prep, *, nhead: int, eps: float = 1e-5):
    """x: (B, S, D) float32, batch_first. `prep` comes from prepare_weights()."""
    B, S, D = x.shape
    Hp = prep["hidden_pad"]
    hd = D // nhead

    # Query tile: whole sequence for small S; 256-row tiles otherwise.
    TQ = S if (S <= 256 or S % 256 != 0) else 256
    nq = S // TQ

    kernel = partial(encoder_layer_kernel, nhead=nhead, hidden_pad=Hp, eps=eps, tq=TQ)

    # Per-generation VMEM budget (v7x: 64 MiB physical per TC; v5e/v6e: 128 MiB).
    try:
        vmem_cap = int(pltpu.get_tpu_info().vmem_capacity_bytes)
    except Exception:
        vmem_cap = 64 * 1024 * 1024
    vmem_limit = max(32 * 1024 * 1024, min(vmem_cap * 7 // 8, 110 * 1024 * 1024))

    wbytes = sum(int(prep[k].size) * prep[k].dtype.itemsize
                 for k in ("wq", "wkv", "wo", "w13", "w2"))
    flops = (2 * B * S * D * D              # Q proj
             + 2 * B * S * D * 2 * D        # KV proj
             + 2 * B * nhead * S * S * hd * 2   # QK^T and PV
             + 2 * B * S * D * D            # out proj
             + 2 * B * S * D * 2 * Hp       # w1|w3
             + 2 * B * S * Hp * D)          # w2
    transcendentals = B * (nhead * S * S + S * Hp + 4 * S)
    bytes_accessed = 2 * B * S * D * 4 + wbytes + 8 * D * 4

    def build(single_buffer_weights):
        def wspec(shape):
            if single_buffer_weights:
                return pl.BlockSpec(shape, lambda b, qi: (0, 0),
                                    pipeline_mode=pl.Buffered(1))
            return pl.BlockSpec(shape, lambda b, qi: (0, 0))

        return pl.pallas_call(
            kernel,
            out_shape=jax.ShapeDtypeStruct((B, S, D), x.dtype),
            grid=(B, nq),
            in_specs=[
                pl.BlockSpec((1, S, D), lambda b, qi: (b, 0, 0)),   # x (full seq per batch)
                wspec((D, D)),          # wq
                wspec((1, D)),          # bq
                wspec((D, 2 * D)),      # wkv
                wspec((1, 2 * D)),      # bkv
                wspec((D, D)),          # wo
                wspec((1, D)),          # bo
                wspec((1, D)),          # norm1
                wspec((1, D)),          # norm2
                wspec((D, 2 * Hp)),     # w13
                wspec((Hp, D)),         # w2
            ],
            out_specs=pl.BlockSpec((1, TQ, D), lambda b, qi: (b, qi, 0)),
            scratch_shapes=[pltpu.VMEM((S, 2 * D), prep["wq"].dtype)],
            compiler_params=pltpu.CompilerParams(
                # qi must stay "arbitrary": KV scratch written at qi==0 is reused
                # by the later q-tiles of the same batch element.
                dimension_semantics=("parallel", "arbitrary"),
                vmem_limit_bytes=int(vmem_limit),
            ),
            cost_estimate=pl.CostEstimate(
                flops=int(flops),
                transcendentals=int(transcendentals),
                bytes_accessed=int(bytes_accessed),
            ),
        )

    args = (x, prep["wq"], prep["bq"], prep["wkv"], prep["bkv"], prep["wo"],
            prep["bo"], prep["n1"], prep["n2"], prep["w13"], prep["w2"])

    use_buffered = hasattr(pl, "Buffered")
    try:
        return build(use_buffered)(*args)
    except Exception:
        if not use_buffered:
            raise
        # pl.Buffered(1) rejected by this jax version -> default double buffering.
        return build(False)(*args)


def _reference_jax(x, params, nhead, eps=1e-5):
    """Pure-JAX fp32 reference mirroring the PyTorch forward (eval mode)."""
    B, S, D = x.shape
    hd = D // nhead
    scale = 1.0 / math.sqrt(hd)

    def rmsnorm(v, w):
        return v * jax.lax.rsqrt(jnp.mean(v * v, -1, keepdims=True) + eps) * w[0]

    xn = rmsnorm(x, params["norm1_w"])
    qkv = jnp.einsum("bsd,ed->bse", xn, params["in_proj_w"]) + params["in_proj_b"][0]
    q, k, v = qkv[..., :D], qkv[..., D:2 * D], qkv[..., 2 * D:]
    q = (q * scale).reshape(B, S, nhead, hd).transpose(0, 2, 1, 3)
    k = k.reshape(B, S, nhead, hd).transpose(0, 2, 1, 3)
    v = v.reshape(B, S, nhead, hd).transpose(0, 2, 1, 3)
    sc = jnp.einsum("bhqd,bhkd->bhqk", q, k)
    p = jax.nn.softmax(sc, axis=-1)
    att = jnp.einsum("bhqk,bhkd->bhqd", p, v).transpose(0, 2, 1, 3).reshape(B, S, D)
    att = jnp.einsum("bsd,ed->bse", att, params["out_proj_w"]) + params["out_proj_b"][0]
    x1 = x + att
    xn2 = rmsnorm(x1, params["norm2_w"])
    h1 = jnp.einsum("bsd,hd->bsh", xn2, params["w1"])
    h3 = jnp.einsum("bsd,hd->bsh", xn2, params["w3"])
    ff = jnp.einsum("bsh,dh->bsd", jax.nn.silu(h1) * h3, params["w2"])
    return x1 + ff


def make_params(key, d_model, nhead, dim_feedforward):
    H = int(2 * dim_feedforward / 3)  # SwiGLU hidden dim
    keys = jax.random.split(key, 7)
    std = 0.02
    return {
        "in_proj_w": std * jax.random.normal(keys[0], (3 * d_model, d_model), jnp.float32),
        "in_proj_b": std * jax.random.normal(keys[1], (1, 3 * d_model), jnp.float32),
        "out_proj_w": std * jax.random.normal(keys[2], (d_model, d_model), jnp.float32),
        "out_proj_b": std * jax.random.normal(keys[3], (1, d_model), jnp.float32),
        "norm1_w": jnp.ones((1, d_model), jnp.float32),
        "norm2_w": jnp.ones((1, d_model), jnp.float32),
        "w1": std * jax.random.normal(keys[4], (H, d_model), jnp.float32),
        "w2": std * jax.random.normal(keys[5], (d_model, H), jnp.float32),
        "w3": std * jax.random.normal(keys[6], (H, d_model), jnp.float32),
    }


if __name__ == "__main__":
    B, S, D = 2, 8, 32
    nhead = 4
    dim_feedforward = 64  # -> SwiGLU hidden = 42 (zero-padded to 128 in-kernel)

    key = jax.random.PRNGKey(0)
    k_x, k_p = jax.random.split(key)
    x = jax.random.normal(k_x, (B, S, D), jnp.float32)
    params = make_params(k_p, D, nhead, dim_feedforward)

    # One-time weight prep (cache & reuse in real deployments).
    prep = prepare_weights(params, nhead=nhead)

    out = replica_transformer_encoder_layer(x, prep, nhead=nhead, eps=1e-5)
    out = jax.block_until_ready(out)

    ref = _reference_jax(x, params, nhead)
    assert out.shape == (B, S, D)
    # bf16 MXU operands + approx reciprocal vs fp32 reference -> looser tolerance.
    assert jnp.allclose(out, ref, atol=2e-2, rtol=2e-2), "mismatch vs JAX reference"

    print("KERNEL_OK")
</pallas_src>

<mosaic_0001>
module attributes {stable_mosaic.version = 11 : i64} {
  func.func @encoder_layer_kernel(%arg0: i32, %arg1: i32, %arg2: memref<1x8x32xf32, #tpu.memory_space<vmem>>, %arg3: memref<32x32xbf16, #tpu.memory_space<vmem>>, %arg4: memref<1x32xf32, #tpu.memory_space<vmem>>, %arg5: memref<32x64xbf16, #tpu.memory_space<vmem>>, %arg6: memref<1x64xf32, #tpu.memory_space<vmem>>, %arg7: memref<32x32xbf16, #tpu.memory_space<vmem>>, %arg8: memref<1x32xf32, #tpu.memory_space<vmem>>, %arg9: memref<1x32xf32, #tpu.memory_space<vmem>>, %arg10: memref<1x32xf32, #tpu.memory_space<vmem>>, %arg11: memref<32x256xbf16, #tpu.memory_space<vmem>>, %arg12: memref<128x32xbf16, #tpu.memory_space<vmem>>, %arg13: memref<1x8x32xf32, #tpu.memory_space<vmem>>, %arg14: memref<8x64xbf16, #tpu.memory_space<vmem>>) attributes {dimension_semantics = [#tpu.dimension_semantics<parallel>, #tpu.dimension_semantics<arbitrary>], iteration_bounds = array<i64: 2, 1>, scalar_prefetch = 0 : i64, scratch_operands = 1 : i64, tpu.core_type = #tpu.core_type<tc>, window_params = [{transform_indices = @transform_0, window_bounds = array<i64: 1, 8, 32>}, {pipeline_mode = #tpu.pipeline_mode<synchronous>, transform_indices = @transform_1, window_bounds = array<i64: 32, 32>}, {pipeline_mode = #tpu.pipeline_mode<synchronous>, transform_indices = @transform_2, window_bounds = array<i64: 1, 32>}, {pipeline_mode = #tpu.pipeline_mode<synchronous>, transform_indices = @transform_3, window_bounds = array<i64: 32, 64>}, {pipeline_mode = #tpu.pipeline_mode<synchronous>, transform_indices = @transform_4, window_bounds = array<i64: 1, 64>}, {pipeline_mode = #tpu.pipeline_mode<synchronous>, transform_indices = @transform_5, window_bounds = array<i64: 32, 32>}, {pipeline_mode = #tpu.pipeline_mode<synchronous>, transform_indices = @transform_6, window_bounds = array<i64: 1, 32>}, {pipeline_mode = #tpu.pipeline_mode<synchronous>, transform_indices = @transform_7, window_bounds = array<i64: 1, 32>}, {pipeline_mode = #tpu.pipeline_mode<synchronous>, transform_indices = @transform_8, window_bounds = array<i64: 1, 32>}, {pipeline_mode = #tpu.pipeline_mode<synchronous>, transform_indices = @transform_9, window_bounds = array<i64: 32, 256>}, {pipeline_mode = #tpu.pipeline_mode<synchronous>, transform_indices = @transform_10, window_bounds = array<i64: 128, 32>}, {transform_indices = @transform_11, window_bounds = array<i64: 1, 8, 32>}]} {
    %c0_i32 = arith.constant 0 : i32
    %0 = arith.cmpi eq, %arg1, %c0_i32 : i32
    %1 = arith.extui %0 : i1 to i32
    %c0_i32_0 = arith.constant 0 : i32
    %2 = arith.cmpi ne, %1, %c0_i32_0 : i32
    scf.if %2 {
      %c0_66 = arith.constant 0 : index
      %c0_67 = arith.constant 0 : index
      %c0_68 = arith.constant 0 : index
      %148 = vector.load %arg2[%c0_66, %c0_67, %c0_68] : memref<1x8x32xf32, #tpu.memory_space<vmem>>, vector<1x8x32xf32>
      %149 = vector.shape_cast %148 : vector<1x8x32xf32> to vector<8x32xf32>
      %150 = arith.mulf %149, %149 : vector<8x32xf32>
      %cst_69 = arith.constant dense<0.000000e+00> : vector<8xf32>
      %151 = vector.multi_reduction <add>, %150, %cst_69 [1] : vector<8x32xf32> to vector<8xf32>
      %152 = vector.shape_cast %151 : vector<8xf32> to vector<8x1xf32>
      %cst_70 = arith.constant 3.200000e+01 : f32
      %153 = vector.broadcast %cst_70 : f32 to vector<8x1xf32>
      %154 = arith.divf %152, %153 : vector<8x1xf32>
      %cst_71 = arith.constant 9.99999974E-6 : f32
      %155 = vector.broadcast %cst_71 : f32 to vector<8x1xf32>
      %156 = arith.addf %154, %155 : vector<8x1xf32>
      %157 = math.rsqrt %156 : vector<8x1xf32>
      %158 = vector.broadcast %157 : vector<8x1xf32> to vector<8x32xf32>
      %159 = arith.mulf %149, %158 : vector<8x32xf32>
      %c0_72 = arith.constant 0 : index
      %c0_73 = arith.constant 0 : index
      %160 = vector.load %arg9[%c0_72, %c0_73] : memref<1x32xf32, #tpu.memory_space<vmem>>, vector<1x32xf32>
      %161 = vector.broadcast %160 : vector<1x32xf32> to vector<8x32xf32>
      %162 = arith.mulf %159, %161 : vector<8x32xf32>
      %163 = arith.truncf %162 : vector<8x32xf32> to vector<8x32xbf16>
      %c0_74 = arith.constant 0 : index
      %c0_75 = arith.constant 0 : index
      %164 = vector.load %arg5[%c0_74, %c0_75] : memref<32x64xbf16, #tpu.memory_space<vmem>>, vector<32x64xbf16>
      %cst_76 = arith.constant dense<0.000000e+00> : vector<8x64xf32>
      %165 = tpu.matmul %163, %164, %cst_76 {dimension_numbers = #tpu.dot_dimension_numbers<[1], [0], [0], [1], [0, 0, 1, 1], [], []>} : vector<8x32xbf16>, vector<32x64xbf16>, vector<8x64xf32> -> vector<8x64xf32>
      %c0_77 = arith.constant 0 : index
      %c0_78 = arith.constant 0 : index
      %166 = vector.load %arg6[%c0_77, %c0_78] : memref<1x64xf32, #tpu.memory_space<vmem>>, vector<1x64xf32>
      %167 = vector.broadcast %166 : vector<1x64xf32> to vector<8x64xf32>
      %168 = arith.addf %165, %167 : vector<8x64xf32>
      %169 = arith.truncf %168 : vector<8x64xf32> to vector<8x64xbf16>
      %c0_79 = arith.constant 0 : index
      %c0_80 = arith.constant 0 : index
      %170 = vector.load %arg14[%c0_79, %c0_80] : memref<8x64xbf16, #tpu.memory_space<vmem>>, vector<8x64xbf16>
      tpu.vector_store %arg14[%c0_79, %c0_80], %169 {strides = array<i32>} : memref<8x64xbf16, #tpu.memory_space<vmem>>, vector<8x64xbf16>,
    } else {
    }
    %c8_i32 = arith.constant 8 : i32
    %3 = arith.muli %arg1, %c8_i32 : i32
    %4 = tpu.assume_multiple %3, 8 : i32
    %c0 = arith.constant 0 : index
    %5 = arith.index_cast %4 : i32 to index
    %c0_1 = arith.constant 0 : index
    %6 = vector.load %arg2[%c0, %5, %c0_1] : memref<1x8x32xf32, #tpu.memory_space<vmem>>, vector<1x8x32xf32>
    %7 = vector.shape_cast %6 : vector<1x8x32xf32> to vector<8x32xf32>
    %8 = arith.mulf %7, %7 : vector<8x32xf32>
    %cst = arith.constant dense<0.000000e+00> : vector<8xf32>
    %9 = vector.multi_reduction <add>, %8, %cst [1] : vector<8x32xf32> to vector<8xf32>
    %10 = vector.shape_cast %9 : vector<8xf32> to vector<8x1xf32>
    %cst_2 = arith.constant 3.200000e+01 : f32
    %11 = vector.broadcast %cst_2 : f32 to vector<8x1xf32>
    %12 = arith.divf %10, %11 : vector<8x1xf32>
    %cst_3 = arith.constant 9.99999974E-6 : f32
    %13 = vector.broadcast %cst_3 : f32 to vector<8x1xf32>
    %14 = arith.addf %12, %13 : vector<8x1xf32>
    %15 = math.rsqrt %14 : vector<8x1xf32>
    %16 = vector.broadcast %15 : vector<8x1xf32> to vector<8x32xf32>
    %17 = arith.mulf %7, %16 : vector<8x32xf32>
    %c0_4 = arith.constant 0 : index
    %c0_5 = arith.constant 0 : index
    %18 = vector.load %arg9[%c0_4, %c0_5] : memref<1x32xf32, #tpu.memory_space<vmem>>, vector<1x32xf32>
    %19 = vector.broadcast %18 : vector<1x32xf32> to vector<8x32xf32>
    %20 = arith.mulf %17, %19 : vector<8x32xf32>
    %21 = arith.truncf %20 : vector<8x32xf32> to vector<8x32xbf16>
    %c0_6 = arith.constant 0 : index
    %c0_7 = arith.constant 0 : index
    %22 = vector.load %arg3[%c0_6, %c0_7] : memref<32x32xbf16, #tpu.memory_space<vmem>>, vector<32x32xbf16>
    %cst_8 = arith.constant dense<0.000000e+00> : vector<8x32xf32>
    %23 = tpu.matmul %21, %22, %cst_8 {dimension_numbers = #tpu.dot_dimension_numbers<[1], [0], [0], [1], [0, 0, 1, 1], [], []>} : vector<8x32xbf16>, vector<32x32xbf16>, vector<8x32xf32> -> vector<8x32xf32>
    %c0_9 = arith.constant 0 : index
    %c0_10 = arith.constant 0 : index
    %24 = vector.load %arg4[%c0_9, %c0_10] : memref<1x32xf32, #tpu.memory_space<vmem>>, vector<1x32xf32>
    %25 = vector.broadcast %24 : vector<1x32xf32> to vector<8x32xf32>
    %26 = arith.addf %23, %25 : vector<8x32xf32>
    %cst_11 = arith.constant 0.000000e+00 : f32
    %27 = vector.broadcast %cst_11 : f32 to vector<8x32xf32>
    %28 = vector.extract_strided_slice %26 {offsets = [0, 0], sizes = [8, 8], strides = [1, 1]} : vector<8x32xf32> to vector<8x8xf32>
    %29 = arith.truncf %28 : vector<8x8xf32> to vector<8x8xbf16>
    %c0_12 = arith.constant 0 : index
    %c0_13 = arith.constant 0 : index
    %30 = vector.load %arg14[%c0_12, %c0_13] : memref<8x64xbf16, #tpu.memory_space<vmem>>, vector<8x8xbf16>
    %c0_14 = arith.constant 0 : index
    %c8 = arith.constant 8 : index
    %31 = vector.load %arg14[%c0_14, %c8] : memref<8x64xbf16, #tpu.memory_space<vmem>>, vector<8x8xbf16>
    "tpu.trace_start"() <{level = 10 : i32, message = "qd,kd->qk"}> : () -> ()
    %cst_15 = arith.constant dense<0.000000e+00> : vector<8x8xf32>
    %32 = tpu.matmul %29, %30, %cst_15 {dimension_numbers = #tpu.dot_dimension_numbers<[1], [1], [0], [0], [0, 0, 1, 0], [], []>} : vector<8x8xbf16>, vector<8x8xbf16>, vector<8x8xf32> -> vector<8x8xf32>
    "tpu.trace_stop"() : () -> ()
    %cst_16 = arith.constant dense<0xFF800000> : vector<8xf32>
    %33 = vector.multi_reduction <maximumf>, %32, %cst_16 [1] : vector<8x8xf32> to vector<8xf32>
    %34 = vector.shape_cast %33 : vector<8xf32> to vector<8x1xf32>
    %35 = vector.broadcast %34 : vector<8x1xf32> to vector<8x8xf32>
    %36 = arith.subf %32, %35 : vector<8x8xf32>
    %37 = math.exp %36 : vector<8x8xf32>
    %cst_17 = arith.constant dense<0.000000e+00> : vector<8xf32>
    %38 = vector.multi_reduction <add>, %37, %cst_17 [1] : vector<8x8xf32> to vector<8xf32>
    %39 = vector.shape_cast %38 : vector<8xf32> to vector<8x1xf32>
    %40 = tpu.reciprocal %39 {approx = true} : vector<8x1xf32> -> vector<8x1xf32>
    %41 = vector.broadcast %40 : vector<8x1xf32> to vector<8x8xf32>
    %42 = arith.mulf %37, %41 : vector<8x8xf32>
    %43 = arith.truncf %42 : vector<8x8xf32> to vector<8x8xbf16>
    %cst_18 = arith.constant dense<0.000000e+00> : vector<8x8xf32>
    %44 = tpu.matmul %43, %31, %cst_18 {dimension_numbers = #tpu.dot_dimension_numbers<[1], [0], [0], [1], [0, 0, 1, 1], [], []>} : vector<8x8xbf16>, vector<8x8xbf16>, vector<8x8xf32> -> vector<8x8xf32>
    %45 = arith.truncf %44 : vector<8x8xf32> to vector<8x8xbf16>
    %c0_19 = arith.constant 0 : index
    %c0_20 = arith.constant 0 : index
    %46 = vector.load %arg7[%c0_19, %c0_20] : memref<32x32xbf16, #tpu.memory_space<vmem>>, vector<8x32xbf16>
    %cst_21 = arith.constant dense<0.000000e+00> : vector<8x32xf32>
    %47 = tpu.matmul %45, %46, %cst_21 {dimension_numbers = #tpu.dot_dimension_numbers<[1], [0], [0], [1], [0, 0, 1, 1], [], []>} : vector<8x8xbf16>, vector<8x32xbf16>, vector<8x32xf32> -> vector<8x32xf32>
    %48 = arith.addf %27, %47 : vector<8x32xf32>
    %49 = vector.extract_strided_slice %26 {offsets = [0, 8], sizes = [8, 8], strides = [1, 1]} : vector<8x32xf32> to vector<8x8xf32>
    %50 = arith.truncf %49 : vector<8x8xf32> to vector<8x8xbf16>
    %c0_22 = arith.constant 0 : index
    %c16 = arith.constant 16 : index
    %51 = vector.load %arg14[%c0_22, %c16] : memref<8x64xbf16, #tpu.memory_space<vmem>>, vector<8x8xbf16>
    %c0_23 = arith.constant 0 : index
    %c24 = arith.constant 24 : index
    %52 = vector.load %arg14[%c0_23, %c24] : memref<8x64xbf16, #tpu.memory_space<vmem>>, vector<8x8xbf16>
    "tpu.trace_start"() <{level = 10 : i32, message = "qd,kd->qk"}> : () -> ()
    %cst_24 = arith.constant dense<0.000000e+00> : vector<8x8xf32>
    %53 = tpu.matmul %50, %51, %cst_24 {dimension_numbers = #tpu.dot_dimension_numbers<[1], [1], [0], [0], [0, 0, 1, 0], [], []>} : vector<8x8xbf16>, vector<8x8xbf16>, vector<8x8xf32> -> vector<8x8xf32>
    "tpu.trace_stop"() : () -> ()
    %cst_25 = arith.constant dense<0xFF800000> : vector<8xf32>
    %54 = vector.multi_reduction <maximumf>, %53, %cst_25 [1] : vector<8x8xf32> to vector<8xf32>
    %55 = vector.shape_cast %54 : vector<8xf32> to vector<8x1xf32>
    %56 = vector.broadcast %55 : vector<8x1xf32> to vector<8x8xf32>
    %57 = arith.subf %53, %56 : vector<8x8xf32>
    %58 = math.exp %57 : vector<8x8xf32>
    %cst_26 = arith.constant dense<0.000000e+00> : vector<8xf32>
    %59 = vector.multi_reduction <add>, %58, %cst_26 [1] : vector<8x8xf32> to vector<8xf32>
    %60 = vector.shape_cast %59 : vector<8xf32> to vector<8x1xf32>
    %61 = tpu.reciprocal %60 {approx = true} : vector<8x1xf32> -> vector<8x1xf32>
    %62 = vector.broadcast %61 : vector<8x1xf32> to vector<8x8xf32>
    %63 = arith.mulf %58, %62 : vector<8x8xf32>
    %64 = arith.truncf %63 : vector<8x8xf32> to vector<8x8xbf16>
    %cst_27 = arith.constant dense<0.000000e+00> : vector<8x8xf32>
    %65 = tpu.matmul %64, %52, %cst_27 {dimension_numbers = #tpu.dot_dimension_numbers<[1], [0], [0], [1], [0, 0, 1, 1], [], []>} : vector<8x8xbf16>, vector<8x8xbf16>, vector<8x8xf32> -> vector<8x8xf32>
    %66 = arith.truncf %65 : vector<8x8xf32> to vector<8x8xbf16>
    %c8_28 = arith.constant 8 : index
    %c0_29 = arith.constant 0 : index
    %67 = vector.load %arg7[%c8_28, %c0_29] : memref<32x32xbf16, #tpu.memory_space<vmem>>, vector<8x32xbf16>
    %cst_30 = arith.constant dense<0.000000e+00> : vector<8x32xf32>
    %68 = tpu.matmul %66, %67, %cst_30 {dimension_numbers = #tpu.dot_dimension_numbers<[1], [0], [0], [1], [0, 0, 1, 1], [], []>} : vector<8x8xbf16>, vector<8x32xbf16>, vector<8x32xf32> -> vector<8x32xf32>
    %69 = arith.addf %48, %68 : vector<8x32xf32>
    %70 = vector.extract_strided_slice %26 {offsets = [0, 16], sizes = [8, 8], strides = [1, 1]} : vector<8x32xf32> to vector<8x8xf32>
    %71 = arith.truncf %70 : vector<8x8xf32> to vector<8x8xbf16>
    %c0_31 = arith.constant 0 : index
    %c32 = arith.constant 32 : index
    %72 = vector.load %arg14[%c0_31, %c32] : memref<8x64xbf16, #tpu.memory_space<vmem>>, vector<8x8xbf16>
    %c0_32 = arith.constant 0 : index
    %c40 = arith.constant 40 : index
    %73 = vector.load %arg14[%c0_32, %c40] : memref<8x64xbf16, #tpu.memory_space<vmem>>, vector<8x8xbf16>
    "tpu.trace_start"() <{level = 10 : i32, message = "qd,kd->qk"}> : () -> ()
    %cst_33 = arith.constant dense<0.000000e+00> : vector<8x8xf32>
    %74 = tpu.matmul %71, %72, %cst_33 {dimension_numbers = #tpu.dot_dimension_numbers<[1], [1], [0], [0], [0, 0, 1, 0], [], []>} : vector<8x8xbf16>, vector<8x8xbf16>, vector<8x8xf32> -> vector<8x8xf32>
    "tpu.trace_stop"() : () -> ()
    %cst_34 = arith.constant dense<0xFF800000> : vector<8xf32>
    %75 = vector.multi_reduction <maximumf>, %74, %cst_34 [1] : vector<8x8xf32> to vector<8xf32>
    %76 = vector.shape_cast %75 : vector<8xf32> to vector<8x1xf32>
    %77 = vector.broadcast %76 : vector<8x1xf32> to vector<8x8xf32>
    %78 = arith.subf %74, %77 : vector<8x8xf32>
    %79 = math.exp %78 : vector<8x8xf32>
    %cst_35 = arith.constant dense<0.000000e+00> : vector<8xf32>
    %80 = vector.multi_reduction <add>, %79, %cst_35 [1] : vector<8x8xf32> to vector<8xf32>
    %81 = vector.shape_cast %80 : vector<8xf32> to vector<8x1xf32>
    %82 = tpu.reciprocal %81 {approx = true} : vector<8x1xf32> -> vector<8x1xf32>
    %83 = vector.broadcast %82 : vector<8x1xf32> to vector<8x8xf32>
    %84 = arith.mulf %79, %83 : vector<8x8xf32>
    %85 = arith.truncf %84 : vector<8x8xf32> to vector<8x8xbf16>
    %cst_36 = arith.constant dense<0.000000e+00> : vector<8x8xf32>
    %86 = tpu.matmul %85, %73, %cst_36 {dimension_numbers = #tpu.dot_dimension_numbers<[1], [0], [0], [1], [0, 0, 1, 1], [], []>} : vector<8x8xbf16>, vector<8x8xbf16>, vector<8x8xf32> -> vector<8x8xf32>
    %87 = arith.truncf %86 : vector<8x8xf32> to vector<8x8xbf16>
    %c16_37 = arith.constant 16 : index
    %c0_38 = arith.constant 0 : index
    %88 = vector.load %arg7[%c16_37, %c0_38] : memref<32x32xbf16, #tpu.memory_space<vmem>>, vector<8x32xbf16>
    %cst_39 = arith.constant dense<0.000000e+00> : vector<8x32xf32>
    %89 = tpu.matmul %87, %88, %cst_39 {dimension_numbers = #tpu.dot_dimension_numbers<[1], [0], [0], [1], [0, 0, 1, 1], [], []>} : vector<8x8xbf16>, vector<8x32xbf16>, vector<8x32xf32> -> vector<8x32xf32>
    %90 = arith.addf %69, %89 : vector<8x32xf32>
    %91 = vector.extract_strided_slice %26 {offsets = [0, 24], sizes = [8, 8], strides = [1, 1]} : vector<8x32xf32> to vector<8x8xf32>
    %92 = arith.truncf %91 : vector<8x8xf32> to vector<8x8xbf16>
    %c0_40 = arith.constant 0 : index
    %c48 = arith.constant 48 : index
    %93 = vector.load %arg14[%c0_40, %c48] : memref<8x64xbf16, #tpu.memory_space<vmem>>, vector<8x8xbf16>
    %c0_41 = arith.constant 0 : index
    %c56 = arith.constant 56 : index
    %94 = vector.load %arg14[%c0_41, %c56] : memref<8x64xbf16, #tpu.memory_space<vmem>>, vector<8x8xbf16>
    "tpu.trace_start"() <{level = 10 : i32, message = "qd,kd->qk"}> : () -> ()
    %cst_42 = arith.constant dense<0.000000e+00> : vector<8x8xf32>
    %95 = tpu.matmul %92, %93, %cst_42 {dimension_numbers = #tpu.dot_dimension_numbers<[1], [1], [0], [0], [0, 0, 1, 0], [], []>} : vector<8x8xbf16>, vector<8x8xbf16>, vector<8x8xf32> -> vector<8x8xf32>
    "tpu.trace_stop"() : () -> ()
    %cst_43 = arith.constant dense<0xFF800000> : vector<8xf32>
    %96 = vector.multi_reduction <maximumf>, %95, %cst_43 [1] : vector<8x8xf32> to vector<8xf32>
    %97 = vector.shape_cast %96 : vector<8xf32> to vector<8x1xf32>
    %98 = vector.broadcast %97 : vector<8x1xf32> to vector<8x8xf32>
    %99 = arith.subf %95, %98 : vector<8x8xf32>
    %100 = math.exp %99 : vector<8x8xf32>
    %cst_44 = arith.constant dense<0.000000e+00> : vector<8xf32>
    %101 = vector.multi_reduction <add>, %100, %cst_44 [1] : vector<8x8xf32> to vector<8xf32>
    %102 = vector.shape_cast %101 : vector<8xf32> to vector<8x1xf32>
    %103 = tpu.reciprocal %102 {approx = true} : vector<8x1xf32> -> vector<8x1xf32>
    %104 = vector.broadcast %103 : vector<8x1xf32> to vector<8x8xf32>
    %105 = arith.mulf %100, %104 : vector<8x8xf32>
    %106 = arith.truncf %105 : vector<8x8xf32> to vector<8x8xbf16>
    %cst_45 = arith.constant dense<0.000000e+00> : vector<8x8xf32>
    %107 = tpu.matmul %106, %94, %cst_45 {dimension_numbers = #tpu.dot_dimension_numbers<[1], [0], [0], [1], [0, 0, 1, 1], [], []>} : vector<8x8xbf16>, vector<8x8xbf16>, vector<8x8xf32> -> vector<8x8xf32>
    %108 = arith.truncf %107 : vector<8x8xf32> to vector<8x8xbf16>
    %c24_46 = arith.constant 24 : index
    %c0_47 = arith.constant 0 : index
    %109 = vector.load %arg7[%c24_46, %c0_47] : memref<32x32xbf16, #tpu.memory_space<vmem>>, vector<8x32xbf16>
    %cst_48 = arith.constant dense<0.000000e+00> : vector<8x32xf32>
    %110 = tpu.matmul %108, %109, %cst_48 {dimension_numbers = #tpu.dot_dimension_numbers<[1], [0], [0], [1], [0, 0, 1, 1], [], []>} : vector<8x8xbf16>, vector<8x32xbf16>, vector<8x32xf32> -> vector<8x32xf32>
    %111 = arith.addf %90, %110 : vector<8x32xf32>
    %c0_49 = arith.constant 0 : index
    %c0_50 = arith.constant 0 : index
    %112 = vector.load %arg8[%c0_49, %c0_50] : memref<1x32xf32, #tpu.memory_space<vmem>>, vector<1x32xf32>
    %113 = vector.broadcast %112 : vector<1x32xf32> to vector<8x32xf32>
    %114 = arith.addf %111, %113 : vector<8x32xf32>
    %115 = arith.addf %7, %114 : vector<8x32xf32>
    %116 = arith.mulf %115, %115 : vector<8x32xf32>
    %cst_51 = arith.constant dense<0.000000e+00> : vector<8xf32>
    %117 = vector.multi_reduction <add>, %116, %cst_51 [1] : vector<8x32xf32> to vector<8xf32>
    %118 = vector.shape_cast %117 : vector<8xf32> to vector<8x1xf32>
    %cst_52 = arith.constant 3.200000e+01 : f32
    %119 = vector.broadcast %cst_52 : f32 to vector<8x1xf32>
    %120 = arith.divf %118, %119 : vector<8x1xf32>
    %cst_53 = arith.constant 9.99999974E-6 : f32
    %121 = vector.broadcast %cst_53 : f32 to vector<8x1xf32>
    %122 = arith.addf %120, %121 : vector<8x1xf32>
    %123 = math.rsqrt %122 : vector<8x1xf32>
    %124 = vector.broadcast %123 : vector<8x1xf32> to vector<8x32xf32>
    %125 = arith.mulf %115, %124 : vector<8x32xf32>
    %c0_54 = arith.constant 0 : index
    %c0_55 = arith.constant 0 : index
    %126 = vector.load %arg10[%c0_54, %c0_55] : memref<1x32xf32, #tpu.memory_space<vmem>>, vector<1x32xf32>
    %127 = vector.broadcast %126 : vector<1x32xf32> to vector<8x32xf32>
    %128 = arith.mulf %125, %127 : vector<8x32xf32>
    %129 = arith.truncf %128 : vector<8x32xf32> to vector<8x32xbf16>
    %c0_56 = arith.constant 0 : index
    %c0_57 = arith.constant 0 : index
    %130 = vector.load %arg11[%c0_56, %c0_57] : memref<32x256xbf16, #tpu.memory_space<vmem>>, vector<32x256xbf16>
    %cst_58 = arith.constant dense<0.000000e+00> : vector<8x256xf32>
    %131 = tpu.matmul %129, %130, %cst_58 {dimension_numbers = #tpu.dot_dimension_numbers<[1], [0], [0], [1], [0, 0, 1, 1], [], []>} : vector<8x32xbf16>, vector<32x256xbf16>, vector<8x256xf32> -> vector<8x256xf32>
    %132 = vector.extract_strided_slice %131 {offsets = [0, 0], sizes = [8, 128], strides = [1, 1]} : vector<8x256xf32> to vector<8x128xf32>
    %133 = vector.extract_strided_slice %131 {offsets = [0, 128], sizes = [8, 128], strides = [1, 1]} : vector<8x256xf32> to vector<8x128xf32>
    %134 = arith.negf %132 : vector<8x128xf32>
    %135 = math.exp %134 : vector<8x128xf32>
    %cst_59 = arith.constant 1.000000e+00 : f32
    %136 = vector.broadcast %cst_59 : f32 to vector<8x128xf32>
    %137 = arith.addf %136, %135 : vector<8x128xf32>
    %138 = arith.divf %136, %137 : vector<8x128xf32>
    %139 = arith.mulf %132, %138 : vector<8x128xf32>
    %140 = arith.mulf %139, %133 : vector<8x128xf32>
    %141 = arith.truncf %140 : vector<8x128xf32> to vector<8x128xbf16>
    %c0_60 = arith.constant 0 : index
    %c0_61 = arith.constant 0 : index
    %142 = vector.load %arg12[%c0_60, %c0_61] : memref<128x32xbf16, #tpu.memory_space<vmem>>, vector<128x32xbf16>
    %cst_62 = arith.constant dense<0.000000e+00> : vector<8x32xf32>
    %143 = tpu.matmul %141, %142, %cst_62 {dimension_numbers = #tpu.dot_dimension_numbers<[1], [0], [0], [1], [0, 0, 1, 1], [], []>} : vector<8x128xbf16>, vector<128x32xbf16>, vector<8x32xf32> -> vector<8x32xf32>
    %144 = arith.addf %115, %143 : vector<8x32xf32>
    %c0_63 = arith.constant 0 : index
    %c0_64 = arith.constant 0 : index
    %c0_65 = arith.constant 0 : index
    %145 = vector.load %arg13[%c0_63, %c0_64, %c0_65] : memref<1x8x32xf32, #tpu.memory_space<vmem>>, vector<1x8x32xf32>
    %146 = vector.shape_cast %145 : vector<1x8x32xf32> to vector<8x32xf32>
    %147 = vector.shape_cast %144 : vector<8x32xf32> to vector<1x8x32xf32>
    tpu.vector_store %arg13[%c0_63, %c0_64, %c0_65], %147 {strides = array<i32>} : memref<1x8x32xf32, #tpu.memory_space<vmem>>, vector<1x8x32xf32>,
    return
  }
  func.func @transform_0(%arg0: i32, %arg1: i32) -> (i32, i32, i32) {
    %c0_i32 = arith.constant 0 : i32
    %c0_i32_0 = arith.constant 0 : i32
    %c0_i32_1 = arith.constant 0 : i32
    return %arg0, %c0_i32, %c0_i32_0 : i32, i32, i32
  }
  func.func @transform_1(%arg0: i32, %arg1: i32) -> (i32, i32) {
    %c0_i32 = arith.constant 0 : i32
    %c0_i32_0 = arith.constant 0 : i32
    %c0_i32_1 = arith.constant 0 : i32
    return %c0_i32, %c0_i32_0 : i32, i32
  }
  func.func @transform_2(%arg0: i32, %arg1: i32) -> (i32, i32) {
    %c0_i32 = arith.constant 0 : i32
    %c0_i32_0 = arith.constant 0 : i32
    %c0_i32_1 = arith.constant 0 : i32
    return %c0_i32, %c0_i32_0 : i32, i32
  }
  func.func @transform_3(%arg0: i32, %arg1: i32) -> (i32, i32) {
    %c0_i32 = arith.constant 0 : i32
    %c0_i32_0 = arith.constant 0 : i32
    %c0_i32_1 = arith.constant 0 : i32
    return %c0_i32, %c0_i32_0 : i32, i32
  }
  func.func @transform_4(%arg0: i32, %arg1: i32) -> (i32, i32) {
    %c0_i32 = arith.constant 0 : i32
    %c0_i32_0 = arith.constant 0 : i32
    %c0_i32_1 = arith.constant 0 : i32
    return %c0_i32, %c0_i32_0 : i32, i32
  }
  func.func @transform_5(%arg0: i32, %arg1: i32) -> (i32, i32) {
    %c0_i32 = arith.constant 0 : i32
    %c0_i32_0 = arith.constant 0 : i32
    %c0_i32_1 = arith.constant 0 : i32
    return %c0_i32, %c0_i32_0 : i32, i32
  }
  func.func @transform_6(%arg0: i32, %arg1: i32) -> (i32, i32) {
    %c0_i32 = arith.constant 0 : i32
    %c0_i32_0 = arith.constant 0 : i32
    %c0_i32_1 = arith.constant 0 : i32
    return %c0_i32, %c0_i32_0 : i32, i32
  }
  func.func @transform_7(%arg0: i32, %arg1: i32) -> (i32, i32) {
    %c0_i32 = arith.constant 0 : i32
    %c0_i32_0 = arith.constant 0 : i32
    %c0_i32_1 = arith.constant 0 : i32
    return %c0_i32, %c0_i32_0 : i32, i32
  }
  func.func @transform_8(%arg0: i32, %arg1: i32) -> (i32, i32) {
    %c0_i32 = arith.constant 0 : i32
    %c0_i32_0 = arith.constant 0 : i32
    %c0_i32_1 = arith.constant 0 : i32
    return %c0_i32, %c0_i32_0 : i32, i32
  }
  func.func @transform_9(%arg0: i32, %arg1: i32) -> (i32, i32) {
    %c0_i32 = arith.constant 0 : i32
    %c0_i32_0 = arith.constant 0 : i32
    %c0_i32_1 = arith.constant 0 : i32
    return %c0_i32, %c0_i32_0 : i32, i32
  }
  func.func @transform_10(%arg0: i32, %arg1: i32) -> (i32, i32) {
    %c0_i32 = arith.constant 0 : i32
    %c0_i32_0 = arith.constant 0 : i32
    %c0_i32_1 = arith.constant 0 : i32
    return %c0_i32, %c0_i32_0 : i32, i32
  }
  func.func @transform_11(%arg0: i32, %arg1: i32) -> (i32, i32, i32) {
    %c0_i32 = arith.constant 0 : i32
    %c0_i32_0 = arith.constant 0 : i32
    return %arg0, %arg1, %c0_i32 : i32, i32, i32
  }
}

module attributes {stable_mosaic.version = 11 : i64} {
  func.func @encoder_layer_kernel(%arg0: i32, %arg1: i32, %arg2: memref<1x8x32xf32, #tpu.memory_space<vmem>>, %arg3: memref<32x32xbf16, #tpu.memory_space<vmem>>, %arg4: memref<1x32xf32, #tpu.memory_space<vmem>>, %arg5: memref<32x64xbf16, #tpu.memory_space<vmem>>, %arg6: memref<1x64xf32, #tpu.memory_space<vmem>>, %arg7: memref<32x32xbf16, #tpu.memory_space<vmem>>, %arg8: memref<1x32xf32, #tpu.memory_space<vmem>>, %arg9: memref<1x32xf32, #tpu.memory_space<vmem>>, %arg10: memref<1x32xf32, #tpu.memory_space<vmem>>, %arg11: memref<32x256xbf16, #tpu.memory_space<vmem>>, %arg12: memref<128x32xbf16, #tpu.memory_space<vmem>>, %arg13: memref<1x8x32xf32, #tpu.memory_space<vmem>>, %arg14: memref<8x64xbf16, #tpu.memory_space<vmem>>) attributes {dimension_semantics = [#tpu.dimension_semantics<parallel>, #tpu.dimension_semantics<arbitrary>], iteration_bounds = array<i64: 2, 1>, scalar_prefetch = 0 : i64, scratch_operands = 1 : i64, tpu.core_type = #tpu.core_type<tc>, window_params = [{transform_indices = @transform_0, window_bounds = array<i64: 1, 8, 32>}, {pipeline_mode = #tpu.pipeline_mode<synchronous>, transform_indices = @transform_1, window_bounds = array<i64: 32, 32>}, {pipeline_mode = #tpu.pipeline_mode<synchronous>, transform_indices = @transform_2, window_bounds = array<i64: 1, 32>}, {pipeline_mode = #tpu.pipeline_mode<synchronous>, transform_indices = @transform_3, window_bounds = array<i64: 32, 64>}, {pipeline_mode = #tpu.pipeline_mode<synchronous>, transform_indices = @transform_4, window_bounds = array<i64: 1, 64>}, {pipeline_mode = #tpu.pipeline_mode<synchronous>, transform_indices = @transform_5, window_bounds = array<i64: 32, 32>}, {pipeline_mode = #tpu.pipeline_mode<synchronous>, transform_indices = @transform_6, window_bounds = array<i64: 1, 32>}, {pipeline_mode = #tpu.pipeline_mode<synchronous>, transform_indices = @transform_7, window_bounds = array<i64: 1, 32>}, {pipeline_mode = #tpu.pipeline_mode<synchronous>, transform_indices = @transform_8, window_bounds = array<i64: 1, 32>}, {pipeline_mode = #tpu.pipeline_mode<synchronous>, transform_indices = @transform_9, window_bounds = array<i64: 32, 256>}, {pipeline_mode = #tpu.pipeline_mode<synchronous>, transform_indices = @transform_10, window_bounds = array<i64: 128, 32>}, {transform_indices = @transform_11, window_bounds = array<i64: 1, 8, 32>}]} {
    %c0_i32 = arith.constant 0 : i32
    %0 = arith.cmpi eq, %arg1, %c0_i32 : i32
    %1 = arith.extui %0 : i1 to i32
    %c0_i32_0 = arith.constant 0 : i32
    %2 = arith.cmpi ne, %1, %c0_i32_0 : i32
    scf.if %2 {
      %c0_66 = arith.constant 0 : index
      %c0_67 = arith.constant 0 : index
      %c0_68 = arith.constant 0 : index
      %148 = vector.load %arg2[%c0_66, %c0_67, %c0_68] : memref<1x8x32xf32, #tpu.memory_space<vmem>>, vector<1x8x32xf32>
      %149 = vector.shape_cast %148 : vector<1x8x32xf32> to vector<8x32xf32>
      %150 = arith.mulf %149, %149 : vector<8x32xf32>
      %cst_69 = arith.constant dense<0.000000e+00> : vector<8xf32>
      %151 = vector.multi_reduction <add>, %150, %cst_69 [1] : vector<8x32xf32> to vector<8xf32>
      %152 = vector.shape_cast %151 : vector<8xf32> to vector<8x1xf32>
      %cst_70 = arith.constant 3.200000e+01 : f32
      %153 = vector.broadcast %cst_70 : f32 to vector<8x1xf32>
      %154 = arith.divf %152, %153 : vector<8x1xf32>
      %cst_71 = arith.constant 9.99999974E-6 : f32
      %155 = vector.broadcast %cst_71 : f32 to vector<8x1xf32>
      %156 = arith.addf %154, %155 : vector<8x1xf32>
      %157 = math.rsqrt %156 : vector<8x1xf32>
      %158 = vector.broadcast %157 : vector<8x1xf32> to vector<8x32xf32>
      %159 = arith.mulf %149, %158 : vector<8x32xf32>
      %c0_72 = arith.constant 0 : index
      %c0_73 = arith.constant 0 : index
      %160 = vector.load %arg9[%c0_72, %c0_73] : memref<1x32xf32, #tpu.memory_space<vmem>>, vector<1x32xf32>
      %161 = vector.broadcast %160 : vector<1x32xf32> to vector<8x32xf32>
      %162 = arith.mulf %159, %161 : vector<8x32xf32>
      %163 = arith.truncf %162 : vector<8x32xf32> to vector<8x32xbf16>
      %c0_74 = arith.constant 0 : index
      %c0_75 = arith.constant 0 : index
      %164 = vector.load %arg5[%c0_74, %c0_75] : memref<32x64xbf16, #tpu.memory_space<vmem>>, vector<32x64xbf16>
      %cst_76 = arith.constant dense<0.000000e+00> : vector<8x64xf32>
      %165 = tpu.matmul %163, %164, %cst_76 {dimension_numbers = #tpu.dot_dimension_numbers<[1], [0], [0], [1], [0, 0, 1, 1], [], []>} : vector<8x32xbf16>, vector<32x64xbf16>, vector<8x64xf32> -> vector<8x64xf32>
      %c0_77 = arith.constant 0 : index
      %c0_78 = arith.constant 0 : index
      %166 = vector.load %arg6[%c0_77, %c0_78] : memref<1x64xf32, #tpu.memory_space<vmem>>, vector<1x64xf32>
      %167 = vector.broadcast %166 : vector<1x64xf32> to vector<8x64xf32>
      %168 = arith.addf %165, %167 : vector<8x64xf32>
      %169 = arith.truncf %168 : vector<8x64xf32> to vector<8x64xbf16>
      %c0_79 = arith.constant 0 : index
      %c0_80 = arith.constant 0 : index
      %170 = vector.load %arg14[%c0_79, %c0_80] : memref<8x64xbf16, #tpu.memory_space<vmem>>, vector<8x64xbf16>
      tpu.vector_store %arg14[%c0_79, %c0_80], %169 {strides = array<i32>} : memref<8x64xbf16, #tpu.memory_space<vmem>>, vector<8x64xbf16>,
    } else {
    }
    %c8_i32 = arith.constant 8 : i32
    %3 = arith.muli %arg1, %c8_i32 : i32
    %4 = tpu.assume_multiple %3, 8 : i32
    %c0 = arith.constant 0 : index
    %5 = arith.index_cast %4 : i32 to index
    %c0_1 = arith.constant 0 : index
    %6 = vector.load %arg2[%c0, %5, %c0_1] : memref<1x8x32xf32, #tpu.memory_space<vmem>>, vector<1x8x32xf32>
    %7 = vector.shape_cast %6 : vector<1x8x32xf32> to vector<8x32xf32>
    %8 = arith.mulf %7, %7 : vector<8x32xf32>
    %cst = arith.constant dense<0.000000e+00> : vector<8xf32>
    %9 = vector.multi_reduction <add>, %8, %cst [1] : vector<8x32xf32> to vector<8xf32>
    %10 = vector.shape_cast %9 : vector<8xf32> to vector<8x1xf32>
    %cst_2 = arith.constant 3.200000e+01 : f32
    %11 = vector.broadcast %cst_2 : f32 to vector<8x1xf32>
    %12 = arith.divf %10, %11 : vector<8x1xf32>
    %cst_3 = arith.constant 9.99999974E-6 : f32
    %13 = vector.broadcast %cst_3 : f32 to vector<8x1xf32>
    %14 = arith.addf %12, %13 : vector<8x1xf32>
    %15 = math.rsqrt %14 : vector<8x1xf32>
    %16 = vector.broadcast %15 : vector<8x1xf32> to vector<8x32xf32>
    %17 = arith.mulf %7, %16 : vector<8x32xf32>
    %c0_4 = arith.constant 0 : index
    %c0_5 = arith.constant 0 : index
    %18 = vector.load %arg9[%c0_4, %c0_5] : memref<1x32xf32, #tpu.memory_space<vmem>>, vector<1x32xf32>
    %19 = vector.broadcast %18 : vector<1x32xf32> to vector<8x32xf32>
    %20 = arith.mulf %17, %19 : vector<8x32xf32>
    %21 = arith.truncf %20 : vector<8x32xf32> to vector<8x32xbf16>
    %c0_6 = arith.constant 0 : index
    %c0_7 = arith.constant 0 : index
    %22 = vector.load %arg3[%c0_6, %c0_7] : memref<32x32xbf16, #tpu.memory_space<vmem>>, vector<32x32xbf16>
    %cst_8 = arith.constant dense<0.000000e+00> : vector<8x32xf32>
    %23 = tpu.matmul %21, %22, %cst_8 {dimension_numbers = #tpu.dot_dimension_numbers<[1], [0], [0], [1], [0, 0, 1, 1], [], []>} : vector<8x32xbf16>, vector<32x32xbf16>, vector<8x32xf32> -> vector<8x32xf32>
    %c0_9 = arith.constant 0 : index
    %c0_10 = arith.constant 0 : index
    %24 = vector.load %arg4[%c0_9, %c0_10] : memref<1x32xf32, #tpu.memory_space<vmem>>, vector<1x32xf32>
    %25 = vector.broadcast %24 : vector<1x32xf32> to vector<8x32xf32>
    %26 = arith.addf %23, %25 : vector<8x32xf32>
    %cst_11 = arith.constant 0.000000e+00 : f32
    %27 = vector.broadcast %cst_11 : f32 to vector<8x32xf32>
    %28 = vector.extract_strided_slice %26 {offsets = [0, 0], sizes = [8, 8], strides = [1, 1]} : vector<8x32xf32> to vector<8x8xf32>
    %29 = arith.truncf %28 : vector<8x8xf32> to vector<8x8xbf16>
    %c0_12 = arith.constant 0 : index
    %c0_13 = arith.constant 0 : index
    %30 = vector.load %arg14[%c0_12, %c0_13] : memref<8x64xbf16, #tpu.memory_space<vmem>>, vector<8x8xbf16>
    %c0_14 = arith.constant 0 : index
    %c8 = arith.constant 8 : index
    %31 = vector.load %arg14[%c0_14, %c8] : memref<8x64xbf16, #tpu.memory_space<vmem>>, vector<8x8xbf16>
    "tpu.trace_start"() <{level = 10 : i32, message = "qd,kd->qk"}> : () -> ()
    %cst_15 = arith.constant dense<0.000000e+00> : vector<8x8xf32>
    %32 = tpu.matmul %29, %30, %cst_15 {dimension_numbers = #tpu.dot_dimension_numbers<[1], [1], [0], [0], [0, 0, 1, 0], [], []>} : vector<8x8xbf16>, vector<8x8xbf16>, vector<8x8xf32> -> vector<8x8xf32>
    "tpu.trace_stop"() : () -> ()
    %cst_16 = arith.constant dense<0xFF800000> : vector<8xf32>
    %33 = vector.multi_reduction <maximumf>, %32, %cst_16 [1] : vector<8x8xf32> to vector<8xf32>
    %34 = vector.shape_cast %33 : vector<8xf32> to vector<8x1xf32>
    %35 = vector.broadcast %34 : vector<8x1xf32> to vector<8x8xf32>
    %36 = arith.subf %32, %35 : vector<8x8xf32>
    %37 = math.exp %36 : vector<8x8xf32>
    %cst_17 = arith.constant dense<0.000000e+00> : vector<8xf32>
    %38 = vector.multi_reduction <add>, %37, %cst_17 [1] : vector<8x8xf32> to vector<8xf32>
    %39 = vector.shape_cast %38 : vector<8xf32> to vector<8x1xf32>
    %40 = tpu.reciprocal %39 {approx = true} : vector<8x1xf32> -> vector<8x1xf32>
    %41 = vector.broadcast %40 : vector<8x1xf32> to vector<8x8xf32>
    %42 = arith.mulf %37, %41 : vector<8x8xf32>
    %43 = arith.truncf %42 : vector<8x8xf32> to vector<8x8xbf16>
    %cst_18 = arith.constant dense<0.000000e+00> : vector<8x8xf32>
    %44 = tpu.matmul %43, %31, %cst_18 {dimension_numbers = #tpu.dot_dimension_numbers<[1], [0], [0], [1], [0, 0, 1, 1], [], []>} : vector<8x8xbf16>, vector<8x8xbf16>, vector<8x8xf32> -> vector<8x8xf32>
    %45 = arith.truncf %44 : vector<8x8xf32> to vector<8x8xbf16>
    %c0_19 = arith.constant 0 : index
    %c0_20 = arith.constant 0 : index
    %46 = vector.load %arg7[%c0_19, %c0_20] : memref<32x32xbf16, #tpu.memory_space<vmem>>, vector<8x32xbf16>
    %cst_21 = arith.constant dense<0.000000e+00> : vector<8x32xf32>
    %47 = tpu.matmul %45, %46, %cst_21 {dimension_numbers = #tpu.dot_dimension_numbers<[1], [0], [0], [1], [0, 0, 1, 1], [], []>} : vector<8x8xbf16>, vector<8x32xbf16>, vector<8x32xf32> -> vector<8x32xf32>
    %48 = arith.addf %27, %47 : vector<8x32xf32>
    %49 = vector.extract_strided_slice %26 {offsets = [0, 8], sizes = [8, 8], strides = [1, 1]} : vector<8x32xf32> to vector<8x8xf32>
    %50 = arith.truncf %49 : vector<8x8xf32> to vector<8x8xbf16>
    %c0_22 = arith.constant 0 : index
    %c16 = arith.constant 16 : index
    %51 = vector.load %arg14[%c0_22, %c16] : memref<8x64xbf16, #tpu.memory_space<vmem>>, vector<8x8xbf16>
    %c0_23 = arith.constant 0 : index
    %c24 = arith.constant 24 : index
    %52 = vector.load %arg14[%c0_23, %c24] : memref<8x64xbf16, #tpu.memory_space<vmem>>, vector<8x8xbf16>
    "tpu.trace_start"() <{level = 10 : i32, message = "qd,kd->qk"}> : () -> ()
    %cst_24 = arith.constant dense<0.000000e+00> : vector<8x8xf32>
    %53 = tpu.matmul %50, %51, %cst_24 {dimension_numbers = #tpu.dot_dimension_numbers<[1], [1], [0], [0], [0, 0, 1, 0], [], []>} : vector<8x8xbf16>, vector<8x8xbf16>, vector<8x8xf32> -> vector<8x8xf32>
    "tpu.trace_stop"() : () -> ()
    %cst_25 = arith.constant dense<0xFF800000> : vector<8xf32>
    %54 = vector.multi_reduction <maximumf>, %53, %cst_25 [1] : vector<8x8xf32> to vector<8xf32>
    %55 = vector.shape_cast %54 : vector<8xf32> to vector<8x1xf32>
    %56 = vector.broadcast %55 : vector<8x1xf32> to vector<8x8xf32>
    %57 = arith.subf %53, %56 : vector<8x8xf32>
    %58 = math.exp %57 : vector<8x8xf32>
    %cst_26 = arith.constant dense<0.000000e+00> : vector<8xf32>
    %59 = vector.multi_reduction <add>, %58, %cst_26 [1] : vector<8x8xf32> to vector<8xf32>
    %60 = vector.shape_cast %59 : vector<8xf32> to vector<8x1xf32>
    %61 = tpu.reciprocal %60 {approx = true} : vector<8x1xf32> -> vector<8x1xf32>
    %62 = vector.broadcast %61 : vector<8x1xf32> to vector<8x8xf32>
    %63 = arith.mulf %58, %62 : vector<8x8xf32>
    %64 = arith.truncf %63 : vector<8x8xf32> to vector<8x8xbf16>
    %cst_27 = arith.constant dense<0.000000e+00> : vector<8x8xf32>
    %65 = tpu.matmul %64, %52, %cst_27 {dimension_numbers = #tpu.dot_dimension_numbers<[1], [0], [0], [1], [0, 0, 1, 1], [], []>} : vector<8x8xbf16>, vector<8x8xbf16>, vector<8x8xf32> -> vector<8x8xf32>
    %66 = arith.truncf %65 : vector<8x8xf32> to vector<8x8xbf16>
    %c8_28 = arith.constant 8 : index
    %c0_29 = arith.constant 0 : index
    %67 = vector.load %arg7[%c8_28, %c0_29] : memref<32x32xbf16, #tpu.memory_space<vmem>>, vector<8x32xbf16>
    %cst_30 = arith.constant dense<0.000000e+00> : vector<8x32xf32>
    %68 = tpu.matmul %66, %67, %cst_30 {dimension_numbers = #tpu.dot_dimension_numbers<[1], [0], [0], [1], [0, 0, 1, 1], [], []>} : vector<8x8xbf16>, vector<8x32xbf16>, vector<8x32xf32> -> vector<8x32xf32>
    %69 = arith.addf %48, %68 : vector<8x32xf32>
    %70 = vector.extract_strided_slice %26 {offsets = [0, 16], sizes = [8, 8], strides = [1, 1]} : vector<8x32xf32> to vector<8x8xf32>
    %71 = arith.truncf %70 : vector<8x8xf32> to vector<8x8xbf16>
    %c0_31 = arith.constant 0 : index
    %c32 = arith.constant 32 : index
    %72 = vector.load %arg14[%c0_31, %c32] : memref<8x64xbf16, #tpu.memory_space<vmem>>, vector<8x8xbf16>
    %c0_32 = arith.constant 0 : index
    %c40 = arith.constant 40 : index
    %73 = vector.load %arg14[%c0_32, %c40] : memref<8x64xbf16, #tpu.memory_space<vmem>>, vector<8x8xbf16>
    "tpu.trace_start"() <{level = 10 : i32, message = "qd,kd->qk"}> : () -> ()
    %cst_33 = arith.constant dense<0.000000e+00> : vector<8x8xf32>
    %74 = tpu.matmul %71, %72, %cst_33 {dimension_numbers = #tpu.dot_dimension_numbers<[1], [1], [0], [0], [0, 0, 1, 0], [], []>} : vector<8x8xbf16>, vector<8x8xbf16>, vector<8x8xf32> -> vector<8x8xf32>
    "tpu.trace_stop"() : () -> ()
    %cst_34 = arith.constant dense<0xFF800000> : vector<8xf32>
    %75 = vector.multi_reduction <maximumf>, %74, %cst_34 [1] : vector<8x8xf32> to vector<8xf32>
    %76 = vector.shape_cast %75 : vector<8xf32> to vector<8x1xf32>
    %77 = vector.broadcast %76 : vector<8x1xf32> to vector<8x8xf32>
    %78 = arith.subf %74, %77 : vector<8x8xf32>
    %79 = math.exp %78 : vector<8x8xf32>
    %cst_35 = arith.constant dense<0.000000e+00> : vector<8xf32>
    %80 = vector.multi_reduction <add>, %79, %cst_35 [1] : vector<8x8xf32> to vector<8xf32>
    %81 = vector.shape_cast %80 : vector<8xf32> to vector<8x1xf32>
    %82 = tpu.reciprocal %81 {approx = true} : vector<8x1xf32> -> vector<8x1xf32>
    %83 = vector.broadcast %82 : vector<8x1xf32> to vector<8x8xf32>
    %84 = arith.mulf %79, %83 : vector<8x8xf32>
    %85 = arith.truncf %84 : vector<8x8xf32> to vector<8x8xbf16>
    %cst_36 = arith.constant dense<0.000000e+00> : vector<8x8xf32>
    %86 = tpu.matmul %85, %73, %cst_36 {dimension_numbers = #tpu.dot_dimension_numbers<[1], [0], [0], [1], [0, 0, 1, 1], [], []>} : vector<8x8xbf16>, vector<8x8xbf16>, vector<8x8xf32> -> vector<8x8xf32>
    %87 = arith.truncf %86 : vector<8x8xf32> to vector<8x8xbf16>
    %c16_37 = arith.constant 16 : index
    %c0_38 = arith.constant 0 : index
    %88 = vector.load %arg7[%c16_37, %c0_38] : memref<32x32xbf16, #tpu.memory_space<vmem>>, vector<8x32xbf16>
    %cst_39 = arith.constant dense<0.000000e+00> : vector<8x32xf32>
    %89 = tpu.matmul %87, %88, %cst_39 {dimension_numbers = #tpu.dot_dimension_numbers<[1], [0], [0], [1], [0, 0, 1, 1], [], []>} : vector<8x8xbf16>, vector<8x32xbf16>, vector<8x32xf32> -> vector<8x32xf32>
    %90 = arith.addf %69, %89 : vector<8x32xf32>
    %91 = vector.extract_strided_slice %26 {offsets = [0, 24], sizes = [8, 8], strides = [1, 1]} : vector<8x32xf32> to vector<8x8xf32>
    %92 = arith.truncf %91 : vector<8x8xf32> to vector<8x8xbf16>
    %c0_40 = arith.constant 0 : index
    %c48 = arith.constant 48 : index
    %93 = vector.load %arg14[%c0_40, %c48] : memref<8x64xbf16, #tpu.memory_space<vmem>>, vector<8x8xbf16>
    %c0_41 = arith.constant 0 : index
    %c56 = arith.constant 56 : index
    %94 = vector.load %arg14[%c0_41, %c56] : memref<8x64xbf16, #tpu.memory_space<vmem>>, vector<8x8xbf16>
    "tpu.trace_start"() <{level = 10 : i32, message = "qd,kd->qk"}> : () -> ()
    %cst_42 = arith.constant dense<0.000000e+00> : vector<8x8xf32>
    %95 = tpu.matmul %92, %93, %cst_42 {dimension_numbers = #tpu.dot_dimension_numbers<[1], [1], [0], [0], [0, 0, 1, 0], [], []>} : vector<8x8xbf16>, vector<8x8xbf16>, vector<8x8xf32> -> vector<8x8xf32>
    "tpu.trace_stop"() : () -> ()
    %cst_43 = arith.constant dense<0xFF800000> : vector<8xf32>
    %96 = vector.multi_reduction <maximumf>, %95, %cst_43 [1] : vector<8x8xf32> to vector<8xf32>
    %97 = vector.shape_cast %96 : vector<8xf32> to vector<8x1xf32>
    %98 = vector.broadcast %97 : vector<8x1xf32> to vector<8x8xf32>
    %99 = arith.subf %95, %98 : vector<8x8xf32>
    %100 = math.exp %99 : vector<8x8xf32>
    %cst_44 = arith.constant dense<0.000000e+00> : vector<8xf32>
    %101 = vector.multi_reduction <add>, %100, %cst_44 [1] : vector<8x8xf32> to vector<8xf32>
    %102 = vector.shape_cast %101 : vector<8xf32> to vector<8x1xf32>
    %103 = tpu.reciprocal %102 {approx = true} : vector<8x1xf32> -> vector<8x1xf32>
    %104 = vector.broadcast %103 : vector<8x1xf32> to vector<8x8xf32>
    %105 = arith.mulf %100, %104 : vector<8x8xf32>
    %106 = arith.truncf %105 : vector<8x8xf32> to vector<8x8xbf16>
    %cst_45 = arith.constant dense<0.000000e+00> : vector<8x8xf32>
    %107 = tpu.matmul %106, %94, %cst_45 {dimension_numbers = #tpu.dot_dimension_numbers<[1], [0], [0], [1], [0, 0, 1, 1], [], []>} : vector<8x8xbf16>, vector<8x8xbf16>, vector<8x8xf32> -> vector<8x8xf32>
    %108 = arith.truncf %107 : vector<8x8xf32> to vector<8x8xbf16>
    %c24_46 = arith.constant 24 : index
    %c0_47 = arith.constant 0 : index
    %109 = vector.load %arg7[%c24_46, %c0_47] : memref<32x32xbf16, #tpu.memory_space<vmem>>, vector<8x32xbf16>
    %cst_48 = arith.constant dense<0.000000e+00> : vector<8x32xf32>
    %110 = tpu.matmul %108, %109, %cst_48 {dimension_numbers = #tpu.dot_dimension_numbers<[1], [0], [0], [1], [0, 0, 1, 1], [], []>} : vector<8x8xbf16>, vector<8x32xbf16>, vector<8x32xf32> -> vector<8x32xf32>
    %111 = arith.addf %90, %110 : vector<8x32xf32>
    %c0_49 = arith.constant 0 : index
    %c0_50 = arith.constant 0 : index
    %112 = vector.load %arg8[%c0_49, %c0_50] : memref<1x32xf32, #tpu.memory_space<vmem>>, vector<1x32xf32>
    %113 = vector.broadcast %112 : vector<1x32xf32> to vector<8x32xf32>
    %114 = arith.addf %111, %113 : vector<8x32xf32>
    %115 = arith.addf %7, %114 : vector<8x32xf32>
    %116 = arith.mulf %115, %115 : vector<8x32xf32>
    %cst_51 = arith.constant dense<0.000000e+00> : vector<8xf32>
    %117 = vector.multi_reduction <add>, %116, %cst_51 [1] : vector<8x32xf32> to vector<8xf32>
    %118 = vector.shape_cast %117 : vector<8xf32> to vector<8x1xf32>
    %cst_52 = arith.constant 3.200000e+01 : f32
    %119 = vector.broadcast %cst_52 : f32 to vector<8x1xf32>
    %120 = arith.divf %118, %119 : vector<8x1xf32>
    %cst_53 = arith.constant 9.99999974E-6 : f32
    %121 = vector.broadcast %cst_53 : f32 to vector<8x1xf32>
    %122 = arith.addf %120, %121 : vector<8x1xf32>
    %123 = math.rsqrt %122 : vector<8x1xf32>
    %124 = vector.broadcast %123 : vector<8x1xf32> to vector<8x32xf32>
    %125 = arith.mulf %115, %124 : vector<8x32xf32>
    %c0_54 = arith.constant 0 : index
    %c0_55 = arith.constant 0 : index
    %126 = vector.load %arg10[%c0_54, %c0_55] : memref<1x32xf32, #tpu.memory_space<vmem>>, vector<1x32xf32>
    %127 = vector.broadcast %126 : vector<1x32xf32> to vector<8x32xf32>
    %128 = arith.mulf %125, %127 : vector<8x32xf32>
    %129 = arith.truncf %128 : vector<8x32xf32> to vector<8x32xbf16>
    %c0_56 = arith.constant 0 : index
    %c0_57 = arith.constant 0 : index
    %130 = vector.load %arg11[%c0_56, %c0_57] : memref<32x256xbf16, #tpu.memory_space<vmem>>, vector<32x256xbf16>
    %cst_58 = arith.constant dense<0.000000e+00> : vector<8x256xf32>
    %131 = tpu.matmul %129, %130, %cst_58 {dimension_numbers = #tpu.dot_dimension_numbers<[1], [0], [0], [1], [0, 0, 1, 1], [], []>} : vector<8x32xbf16>, vector<32x256xbf16>, vector<8x256xf32> -> vector<8x256xf32>
    %132 = vector.extract_strided_slice %131 {offsets = [0, 0], sizes = [8, 128], strides = [1, 1]} : vector<8x256xf32> to vector<8x128xf32>
    %133 = vector.extract_strided_slice %131 {offsets = [0, 128], sizes = [8, 128], strides = [1, 1]} : vector<8x256xf32> to vector<8x128xf32>
    %134 = arith.negf %132 : vector<8x128xf32>
    %135 = math.exp %134 : vector<8x128xf32>
    %cst_59 = arith.constant 1.000000e+00 : f32
    %136 = vector.broadcast %cst_59 : f32 to vector<8x128xf32>
    %137 = arith.addf %136, %135 : vector<8x128xf32>
    %138 = arith.divf %136, %137 : vector<8x128xf32>
    %139 = arith.mulf %132, %138 : vector<8x128xf32>
    %140 = arith.mulf %139, %133 : vector<8x128xf32>
    %141 = arith.truncf %140 : vector<8x128xf32> to vector<8x128xbf16>
    %c0_60 = arith.constant 0 : index
    %c0_61 = arith.constant 0 : index
    %142 = vector.load %arg12[%c0_60, %c0_61] : memref<128x32xbf16, #tpu.memory_space<vmem>>, vector<128x32xbf16>
    %cst_62 = arith.constant dense<0.000000e+00> : vector<8x32xf32>
    %143 = tpu.matmul %141, %142, %cst_62 {dimension_numbers = #tpu.dot_dimension_numbers<[1], [0], [0], [1], [0, 0, 1, 1], [], []>} : vector<8x128xbf16>, vector<128x32xbf16>, vector<8x32xf32> -> vector<8x32xf32>
    %144 = arith.addf %115, %143 : vector<8x32xf32>
    %c0_63 = arith.constant 0 : index
    %c0_64 = arith.constant 0 : index
    %c0_65 = arith.constant 0 : index
    %145 = vector.load %arg13[%c0_63, %c0_64, %c0_65] : memref<1x8x32xf32, #tpu.memory_space<vmem>>, vector<1x8x32xf32>
    %146 = vector.shape_cast %145 : vector<1x8x32xf32> to vector<8x32xf32>
    %147 = vector.shape_cast %144 : vector<8x32xf32> to vector<1x8x32xf32>
    tpu.vector_store %arg13[%c0_63, %c0_64, %c0_65], %147 {strides = array<i32>} : memref<1x8x32xf32, #tpu.memory_space<vmem>>, vector<1x8x32xf32>,
    return
  }
  func.func @transform_0(%arg0: i32, %arg1: i32) -> (i32, i32, i32) {
    %c0_i32 = arith.constant 0 : i32
    %c0_i32_0 = arith.constant 0 : i32
    %c0_i32_1 = arith.constant 0 : i32
    return %arg0, %c0_i32, %c0_i32_0 : i32, i32, i32
  }
  func.func @transform_1(%arg0: i32, %arg1: i32) -> (i32, i32) {
    %c0_i32 = arith.constant 0 : i32
    %c0_i32_0 = arith.constant 0 : i32
    %c0_i32_1 = arith.constant 0 : i32
    return %c0_i32, %c0_i32_0 : i32, i32
  }
  func.func @transform_2(%arg0: i32, %arg1: i32) -> (i32, i32) {
    %c0_i32 = arith.constant 0 : i32
    %c0_i32_0 = arith.constant 0 : i32
    %c0_i32_1 = arith.constant 0 : i32
    return %c0_i32, %c0_i32_0 : i32, i32
  }
  func.func @transform_3(%arg0: i32, %arg1: i32) -> (i32, i32) {
    %c0_i32 = arith.constant 0 : i32
    %c0_i32_0 = arith.constant 0 : i32
    %c0_i32_1 = arith.constant 0 : i32
    return %c0_i32, %c0_i32_0 : i32, i32
  }
  func.func @transform_4(%arg0: i32, %arg1: i32) -> (i32, i32) {
    %c0_i32 = arith.constant 0 : i32
    %c0_i32_0 = arith.constant 0 : i32
    %c0_i32_1 = arith.constant 0 : i32
    return %c0_i32, %c0_i32_0 : i32, i32
  }
  func.func @transform_5(%arg0: i32, %arg1: i32) -> (i32, i32) {
    %c0_i32 = arith.constant 0 : i32
    %c0_i32_0 = arith.constant 0 : i32
    %c0_i32_1 = arith.constant 0 : i32
    return %c0_i32, %c0_i32_0 : i32, i32
  }
  func.func @transform_6(%arg0: i32, %arg1: i32) -> (i32, i32) {
    %c0_i32 = arith.constant 0 : i32
    %c0_i32_0 = arith.constant 0 : i32
    %c0_i32_1 = arith.constant 0 : i32
    return %c0_i32, %c0_i32_0 : i32, i32
  }
  func.func @transform_7(%arg0: i32, %arg1: i32) -> (i32, i32) {
    %c0_i32 = arith.constant 0 : i32
    %c0_i32_0 = arith.constant 0 : i32
    %c0_i32_1 = arith.constant 0 : i32
    return %c0_i32, %c0_i32_0 : i32, i32
  }
  func.func @transform_8(%arg0: i32, %arg1: i32) -> (i32, i32) {
    %c0_i32 = arith.constant 0 : i32
    %c0_i32_0 = arith.constant 0 : i32
    %c0_i32_1 = arith.constant 0 : i32
    return %c0_i32, %c0_i32_0 : i32, i32
  }
  func.func @transform_9(%arg0: i32, %arg1: i32) -> (i32, i32) {
    %c0_i32 = arith.constant 0 : i32
    %c0_i32_0 = arith.constant 0 : i32
    %c0_i32_1 = arith.constant 0 : i32
    return %c0_i32, %c0_i32_0 : i32, i32
  }
  func.func @transform_10(%arg0: i32, %arg1: i32) -> (i32, i32) {
    %c0_i32 = arith.constant 0 : i32
    %c0_i32_0 = arith.constant 0 : i32
    %c0_i32_1 = arith.constant 0 : i32
    return %c0_i32, %c0_i32_0 : i32, i32
  }
  func.func @transform_11(%arg0: i32, %arg1: i32) -> (i32, i32, i32) {
    %c0_i32 = arith.constant 0 : i32
    %c0_i32_0 = arith.constant 0 : i32
    return %arg0, %arg1, %c0_i32 : i32, i32, i32
  }
}

</mosaic_0001>

<bundles_post_ra>
// kernel: tpu_custom_call.1
= control target key start
LH: loop header
LB: loop body
LE: loop exit
PB: predicated region body
PF: predicated region fallthrough
CT: control target
= control target key end

     0   :  { %16 = vsyncpa [#allocation4], 0  ;;  %s2398_s0 = inlined_call_operand.vmem [shape: f32[2,8,32], index: 0, kind: input, shape index: {}]   ;;  %s2399_s1 = inlined_call_operand.vmem [shape: bf16[32,32], index: 1, kind: input, shape index: {}]   ;;  %s2400_s2 = inlined_call_operand.vmem [shape: f32[1,32], index: 2, kind: input, shape index: {}]   ;;  %s2401_s3 = inlined_call_operand.vmem [shape: bf16[32,64], index: 3, kind: input, shape index: {}]   ;;  %s2402_s4 = inlined_call_operand.vmem [shape: f32[1,64], index: 4, kind: input, shape index: {}]   ;;  %s2403_s5 = inlined_call_operand.hbm [shape: bf16[32,32], index: 5, kind: input, shape index: {}]   ;;  %s2404_s6 = inlined_call_operand.vmem [shape: f32[1,32], index: 6, kind: input, shape index: {}]   ;;  %s2405_s7 = inlined_call_operand.vmem [shape: f32[1,32], index: 7, kind: input, shape index: {}]   ;;  %s2406_s8 = inlined_call_operand.vmem [shape: f32[1,32], index: 8, kind: input, shape index: {}]   ;;  %s2407_s9 = inlined_call_operand.vmem [shape: bf16[32,256], index: 9, kind: input, shape index: {}]   ;;  %s2408_s10 = inlined_call_operand.vmem [shape: bf16[128,32], index: 10, kind: input, shape index: {}]   ;;  %s2409_s11 = inlined_call_operand.hbm [shape: f32[2,8,32], index: 11, kind: output, shape index: {}]  }
   0x1   :  { %17 = vsyncpa [#allocation5], 0 }
   0x2   :  { %19 = vsyncpa [#allocation5 + $0x1], 0  ;;  %s2063_s17 = smov 0   ;;  %s2065_s18 = smov 0  }
   0x3   :  { %s2067_s19 = smov 0   ;;  %s2069_s20 = smov 0  }
   0x4   :  { %s2071_s21 = smov 0   ;;  %s2073_s22 = smov 0  }
   0x5 LB: > { %2416 = sst [smem:[#allocation9_spill]] %s1983_s21  ;;  %s1549_s23 = sadd.s32 4294967295, %s1987_s22   ;;  %s1987_s22 = sphi %s2073_s22, %s25_s22   ;;  %s1983_s21 = sphi %s2071_s21, %s2430_s21   ;;  %s1979_s20 = sphi %s2069_s20, %s2429_s20   ;;  %s1975_s19 = sphi %s2067_s19, %s2433_s19   ;;  %s1971_s18 = sphi %s2065_s18, %s2432_s18   ;;  %s1967_s17 = sphi %s2063_s17, %s2431_s17  }
   0x6   : > { %s1550_s24 = sadd.s32 4294967294, %s1987_s22   ;;  %s37_s25 = sadd.s32 1, %s1983_s21 }
   0x7   : > { %s282_s26 = sadd.s32 1, %s1975_s19  ;;  %p39_p0 = scmp.ge.s32.totalorder %s37_s25, 2 }
   0x8   : > { %p292_p1 = scmp.ne.s32.totalorder %s1975_s19, %s1971_s18  ;;  %p293_p2 = scmp.eq.s32.totalorder %s1549_s23, 1 }
   0x9   : > { %p298_p3 = scmp.ne.s32.totalorder %s1971_s18, %s1967_s17  ;;  %s2435_s25 = smov (%p39_p0, %s37_s25), 0 }
   0xa   : > { %2417 = sst [smem:[#allocation10_spill]] %s2435_s25  ;;  %p2103_p4 = por %p293_p2, %p292_p1 }
   0xb   : > { %p299_p5 = scmp.eq.s32.totalorder %s1550_s24, 1  ;;  %s277_s28 = ssub.s32 %s1983_s21, %s2435_s25 }
   0xc   : > { %s2418_s27 = scalar_select %p2103_p4, 1, 0 }
   0xd   : > { %p1551_p6 = scmp.ge.s32.totalorder %s1987_s22, 1  ;;  %p280_p7 = scmp.eq.s32.totalorder %s277_s28, 0 }
   0xe   : > { %p2110_p8 = por %p299_p5, %p298_p3  ;;  %p306_p9 = scmp.lt.s32.totalorder %s1987_s22, 3 }
   0xf   : > { %s2116_s30 = scalar_select %p280_p7, %s1975_s19, %s282_s26  }
  0x10   : > { %s2419_s29 = scalar_select %p2110_p8, 1, 0 }
  0x11   : > { %2420 = sst [smem:[#allocation11_spill]] %s2116_s30  ;;  %p2118_p10 = pnand %p1551_p6, %p306_p9 }
  0x12   : > { %p2122_p11 = scmp.eq.s32.totalorder %s1549_s23, 0  ;;  %s1989_s14 = smov [#allocation3]  }
  0x13   : > { %s2421_s12 = scalar_select %p2118_p10, 1, 0 }
  0x14   : > { %s2422_s13 = scalar_select %p2122_p11, 1, 0 }
  0x15   : > { %p1757_p12 = pneg %p2118_p10  ;;  %s330_s15 = sshll.u32 %s1989_s14, 4  ;;  %s331_s15 = int_to_ptr.vmem [resolvable:$true] %s330_s15 }
  0x16   : > { %s1877_s28 = scalar_lea.hbm %s2403_s5, 256 }
  0x17   : > { %p2130_p13 = pnand %p2122_p11, %p1757_p12  ;;  %p1878_p0 = scmp.ne.s32.totalorder %s2403_s5, %s1877_s28 }
  0x18   : > { %p1884_p5 = scmp.lt.u32.totalorder %s1877_s28, %s2403_s5 }
  0x19   : > { %p1879_p1 = pneg %p2130_p13 }
  0x1b   : > { %p1880_p2 = pnand %p1879_p1, %p1878_p0 }
  0x1d   : > { %p1881_p3 = pneg %p1880_p2 }
  0x1f   : > { %p1886_p6 = pnand %p1884_p5, %p1881_p3 }
  0x21   : > { %1889 = shalt.err (!%p1886_p6)
}
  0x22   : > { %s1890_s30 = scalar_lea.vmem %s331_s15, 256  ;;  %p1898_p8 = scmp.lt.s32.totalorder %s331_s15, %s331_s15 }
  0x23   : > { %p1891_p7 = scmp.ne.s32.totalorder %s331_s15, %s1890_s30  ;;  %p1899_p4 = scmp.lt.s32.totalorder %s1890_s30, %s1890_s30 }
  0x25   : > { %p1893_p9 = pnand %p1891_p7, %p1879_p1  ;;  %p1900_p11 = por %p1899_p4, %p1898_p8 }
  0x27   : > { %p1894_p12 = pneg %p1893_p9 }
  0x29   : > { %p1901_p10 = pnand %p1900_p11, %p1894_p12 }
  0x2b   : > { %1904 = shalt.err (!%p1901_p10)
}
  0x2c   : > { %s1990_s25 = smov 64   ;;  %s1991_s24 = smov 4  }
  0x2d   : > { %1760 = dma.hbm_to_vmem [thread:$0]  (!%p2130_p13), %s2403_s5, 256, %s331_s15, [#allocation4], %s1990_s25, %s1990_s25, %s1991_s24  }
  0x2e   : > { %p2424_p0 = scmp.ne.s32.totalorder %s2421_s12, 0 }
  0x2f   : > { %p2425_p2 = scmp.ne.s32.totalorder (!%p2424_p0), %s2422_s13, 0 }
  0x30   : > { %368 = sbr.rel (%p2424_p0) target bundleno = 3461 (0xd85), region = 64 }
  0x37   : > { %1958 = dma.done.wait (%p2425_p2), [#allocation4], 256  }
  0x38   : > { %1960 = vsyncadd (%p2425_p2), [#allocation4], 4294967040  ;;  %p407_p4 = scmp.lt.s32.totalorder %s1979_s20, 1  ;;  %vm418_vm0 = vcmask 261120   ;;  %v1829_v3 = vld [vmem:[%s2401_s3] sm:$0xff]   ;;  %v1992_v4 = vmov 0.0  }
  0x39   : > { %1643 = vmatprep.subr.bf16.mxu0 %v1992_v4  ;;  %1665 = vmatprep.subr.bf16.mxu1 %v1992_v4  ;;  %v1830_v5 = vld [vmem:[%s2401_s3 + $0x8] sm:$0xff]   ;;  %vm1993_vm1 = vmmov 0   ;;  %v1558_v13 = vld [vmem:[%s2405_s7] ss:$0 sm:$0xff]  ;;  %vm503_vm2 = vcmask 519168   ;;  %vm595_vm3 = vcmask 64512  }
  0x3a   : > { %s408_s21 = scalar_select %p407_p4, %s1979_s20, 1  ;;  %1644 = vmatpush3.bf16.msra.mxu0 %v1829_v3  ;;  %1647 = vmatprep.mubr.msk.bf16.mxu0 %vm1993_vm1, %v1992_v4  ;;  %v1831_v17 = vld [vmem:[%s2399_s1] sm:$0xff]   ;;  %v1832_v21 = vld [vmem:[%s2399_s1 + $0x8] sm:$0xff]   ;;  %vm662_vm4 = vcmask 1043456  }
  0x3b   : > { %1645 = vmatprep.subr.bf16.mxu0 %v1992_v4  ;;  %1667 = vmatprep.mubr.msk.bf16.mxu1 %vm1993_vm1, %v1992_v4  ;;  %v1559_v23 = vld [vmem:[%s2402_s4] ss:$0 sm:$0xff]  ;;  %s1994_s15 = smov 112   ;;  %s1995_s25 = smov 120  }
  0x3c   : > { %s1557_s30 = sshll.u32 %s408_s21, 3  ;;  %v1564_v30 = vld [vmem:[%s2400_s2] ss:$0 sm:$0xff]  ;;  %s1996_s24 = smov 96  }
  0x3d   : > { %s410_s14 = scalar_lea.vmem %s2398_s0, %s1557_s30  ;;  %s1997_s26 = smov 104  }
  0x3e   : > { %v2161_v0 = vld [vmem:[%s410_s14] sm:$0xff]  ;;  %1646 = vmatpush3.bf16.msra.mxu0 %v1830_v5  ;;  %s1998_s23 = smov 88   ;;  %s1999_s21 = smov 80  }
  0x3f   : > { %v417_v1 = vmul.f32 %v2161_v0, %v2161_v0  ;;  %1651 = vmatprep.subr.bf16.mxu0 %v1992_v4  ;;  %s2000_s30 = smov 72   ;;  %s404_s13 = sand.u32 1, %s1971_s18  }
  0x40   : > { %p2426_p10 = scmp.ne.s32.totalorder %s2418_s27, 0  ;;  %s2002_s16 = smov [#allocation6]  }
  0x41   : > { %v419_v2 = vsel %vm418_vm0, %v417_v1, 0.0  ;;  %s1909_s14 = sshll.u32 %s2002_s16, 4  ;;  %s1910_s14 = int_to_ptr.vmem [resolvable:$false] %s1909_s14 }
  0x42   : > { %420 = vadd.xlane.f32.xlu0 %v419_v2  ;;  %s1911_s12 = scalar_lea.vmem %s1910_s14, 256 }
  0x46   : > { %511 = vadd.xlane.f32.xlu0 %v419_v2 }
  0xcf   : > { %v421_v6 = vpop.xlane.xlu0 %420 }
  0xd0   : > { %v423_v7 = vmul.f32 0.03125, %v421_v6 }
  0xd2   : > { %v424_v8 = vadd.f32 1e-05, %v423_v7 }
  0xd3   : > { %v512_v9 = vpop.xlane.xlu0 %511 }
  0xd4   : > { %1851 = vrsqrt.f32 %v424_v8  ;;  %v514_v10 = vmul.f32 0.03125, %v512_v9  ;;  %v824_v9 = vld [vmem:[#allocation3 + $0x4] sm:$0xf] }
  0xd6   : > { %v515_v11 = vadd.f32 1e-05, %v514_v10  ;;  %v829_v10 = vsel %vm662_vm4, %v824_v9, 0 }
  0xd8   : > { %1853 = vrsqrt.f32 %v515_v11 }
  0xde   : > { %v1852_v12 = vpop.eup %1851 }
  0xdf   : > { %v426_v14 = vmul.f32 %v1852_v12, %v2161_v0 }
  0xe1   : > { %v434_v15 = vmul.f32 %v1558_v13, %v426_v14 }
  0xe2   : > { %v1854_v16 = vpop.eup %1853 }
  0xe3   : > { %v517_v18 = vmul.f32 %v1854_v16, %v2161_v0  ;;  %v435_v19 = vpack.c.bf16 %v434_v15, %v434_v15  ;;  %v707_v15 = vld [vmem:[#allocation3] sm:$0xf] }
  0xe5   : > { %1648 = vmatmul.mubr.msk.bf16.vlgmr.msra.gmra.mrb[0].mxu0 %vm418_vm0, %v435_v19  ;;  %v525_v20 = vmul.f32 %v1558_v13, %v517_v18  ;;  %v875_v18 = vsel %vm662_vm4, %v707_v15, 0 }
  0xe6   : > { %1652 = vmatpush3.bf16.msra.mxu0 %v1831_v17  ;;  %1655 = vmatprep.mubr.msk.bf16.mxu0 %vm1993_vm1, %v1992_v4 }
  0xe7   : > { %1653 = vmatprep.subr.bf16.mxu0 %v1992_v4  ;;  %v526_v22 = vpack.c.bf16 %v525_v20, %v525_v20 }
  0xea   : > { %1654 = vmatpush3.bf16.msra.mxu0 %v1832_v21 }
  0xeb   : > { %1659 = vmatprep.subr.bf16.mxu0 %v1992_v4 }
  0xed   : > { %1656 = vmatmul.mubr.msk.bf16.vlgmr.msra.gmra.mrb[4].mxu0 %vm418_vm0, %v526_v22 }
  0xee   : > { %1661 = vmatprep.mubr.msk.bf16.mxu0 %vm1993_vm1, %v1992_v4 }
 0x1b8   : > { %v496_v24 = vpop.f32.mrb[0].mxu0 }
 0x1b9   : > { %v497_v25 = vadd.f32 %v1559_v23, %v496_v24  ;;  %v1649_v26 = vpop.f32.mrb[1].mxu0 }
 0x1ba   : > { %v499_v27 = vpop.f32.mrb[2].mxu0 }
 0x1bb   : > { %v502_v28 = vpack.c.bf16 %v497_v25, %v497_v25  ;;  %v1650_v29 = vpop.f32.mrb[3].mxu0 }
 0x1bd   : > { %504 = vst.msk [vmem:[#allocation2] sm:$0xf] %vm503_vm2, %v502_v28 }
 0x1c0   : > { %v587_v31 = vpop.f32.mrb[4].mxu0 }
 0x1c1   : > { %v1657_v32 = vpop.f32.mrb[5].mxu0  ;;  %v588_v33 = vadd.f32 %v1564_v30, %v587_v31 }
 0x1c2   : > { %v590_v34 = vpop.f32.mrb[6].mxu0 }
 0x1c3   : > { %v1658_v35 = vpop.f32.mrb[7].mxu0  ;;  %v2207_v39 = vpack.c.bf16 %v588_v33, %v588_v33 }
 0x1c4   : > { %v594_v36 = vld [vmem:[#allocation2] sm:$0xf] }
 0x1c5   : > { %v1833_v37 = vld [vmem:[#allocation2] ss:$0 sps:$4 sm:$0xff]   ;;  %v600_v38 = vsel %vm595_vm3, %v594_v36, 0  ;;  %v1569_v48 = vcombine.low %v594_v36, %v594_v36 }
 0x1c6   : > { %1660 = vmatpush3.bf16.xpose.msra.mxu0 %v600_v38  ;;  %715 = vrot.lane.b32.xlu1 %v1833_v37, %s1994_s15  ;;  %v2222_v54 = vld [vmem:[#allocation2] ss:$0 sps:$4 sm:$0xff]  }
 0x1c7   : > { %1671 = vmatprep.subr.bf16.mxu0 %v1992_v4 }
 0x1ca   : > { %710 = vrot.lane.b32.xlu1 %v2207_v39, %s1995_s25 }
 0x1cd   : > { %1662 = vmatmul.mubr.msk.bf16.vlgmr.msra.gmra.mrb[8].mxu0 %vm595_vm3, %v2207_v39 }
 0x1ce   : > { %1673 = vmatprep.mubr.msk.bf16.mxu0 %vm1993_vm1, %v1992_v4 }
 0x238   : > { %v716_v40 = vpop.permute.xlu1 %715 }
 0x239   : > { %v721_v41 = vsel %vm595_vm3, %v716_v40, 0 }
 0x23a   : > { %1672 = vmatpush3.bf16.xpose.msra.mxu0 %v721_v41 }
 0x23b   : > { %1683 = vmatprep.subr.bf16.mxu0 %v1992_v4 }
 0x23c   : > { %v711_v42 = vpop.permute.xlu1 %710 }
 0x241   : > { %1674 = vmatmul.mubr.msk.bf16.vlgmr.msra.gmra.mrb[12].mxu0 %vm595_vm3, %v711_v42 }
 0x242   : > { %1685 = vmatprep.mubr.msk.bf16.mxu0 %vm1993_vm1, %v1992_v4  ;;  %1684 = vmatpush3.bf16.msra.mxu0 %v829_v10 }
 0x243   : > { %1695 = vmatprep.subr.bf16.mxu0 %v1992_v4 }
 0x2a0   : > { %v636_v43 = vpop.f32.mrb[8].mxu0 }
 0x2a1   : > { %v1663_v44 = vpop.f32.mrb[9].mxu0  ;;  %v642_v45 = vsel %vm595_vm3, %v636_v43, -inf }
 0x2a2   : > { %643 = vmax.xlane.f32.xlu0 %v642_v45  ;;  %v639_v46 = vpop.f32.mrb[10].mxu0 }
 0x2a3   : > { %v1664_v47 = vpop.f32.mrb[11].mxu0 }
 0x2b8   : > { %657 = vrot.lane.b32.xlu0 %v1569_v48, %s1995_s25  ;;  %s1601_s25 = sshll.u32 %s1979_s20, 7  ;;  %s1453_s20 = scalar_lea.sflag [#allocation5], %s404_s13 }
 0x314   : > { %v757_v49 = vpop.f32.mrb[12].mxu0 }
 0x315   : > { %v1675_v50 = vpop.f32.mrb[13].mxu0  ;;  %v763_v51 = vsel %vm595_vm3, %v757_v49, -inf }
 0x316   : > { %764 = vmax.xlane.f32.xlu1 %v763_v51  ;;  %v760_v52 = vpop.f32.mrb[14].mxu0 }
 0x317   : > { %v1676_v53 = vpop.f32.mrb[15].mxu0 }
 0x327   : > { %923 = vrot.lane.b32.xlu1 %v2222_v54, %s1996_s24 }
 0x32f   : > { %v644_v55 = vpop.xlane.xlu0 %643 }
 0x330   : > { %v645_v56 = vsub.f32 %v636_v43, %v644_v55  ;;  %v1836_v55 = vld [vmem:[#allocation2] ss:$0 sps:$4 sm:$0xff]  }
 0x332   : > { %v646_v57 = vmul.f32 1.442695, %v645_v56 }
 0x333   : > { %v658_v58 = vpop.permute.xlu0 %657 }
 0x334   : > { %1855 = vpow2.f32 %v646_v57  ;;  %v664_v59 = vsel %vm662_vm4, %v658_v58, 0 }
 0x335   : > { %1666 = vmatpush3.bf16.msra.mxu1 %v664_v59 }
 0x336   : > { %1677 = vmatprep.subr.bf16.mxu1 %v1992_v4 }
 0x33e   : > { %v1856_v60 = vpop.eup %1855 }
 0x33f   : > { %v648_v61 = vsel %vm595_vm3, %v1856_v60, 0.0 }
 0x340   : > { %649 = vadd.xlane.f32.xlu0 %v648_v61  ;;  %v1032_v61 = vld [vmem:[#allocation3 + $0x8] sm:$0xf] }
 0x3a3   : > { %v765_v62 = vpop.xlane.xlu1 %764 }
 0x3a4   : > { %v766_v63 = vsub.f32 %v757_v49, %v765_v62  ;;  %v1037_v62 = vsel %vm662_vm4, %v1032_v61, 0  ;;  %v1848_v61 = vld [vmem:[%s2408_s10 + $0x28] sm:$0xff]  }
 0x3a6   : > { %v767_v1 = vmul.f32 1.442695, %v766_v63 }
 0x3a7   : > { %v924_v24 = vpop.permute.xlu1 %923 }
 0x3a8   : > { %1857 = vpow2.f32 %v767_v1  ;;  %v929_v29 = vsel %vm595_vm3, %v924_v24, 0 }
 0x3b2   : > { %v1858_v2 = vpop.eup %1857 }
 0x3b3   : > { %v769_v3 = vsel %vm595_vm3, %v1858_v2, 0.0 }
 0x3b4   : > { %770 = vadd.xlane.f32.xlu0 %v769_v3 }
 0x3ca   : > { %775 = vrot.lane.b32.xlu0 %v1833_v37, %s1997_s26 }
 0x3cd   : > { %v650_v5 = vpop.xlane.xlu0 %649 }
 0x3ce   : > { %1859 = vrcp.f32 %v650_v5  ;;  %918 = vrot.lane.b32.xlu0 %v2207_v39, %s1994_s15  ;;  %s1556_s15 = sshll.u32 %s404_s13, 3 }
 0x3cf   : > { %s406_s24 = scalar_lea.vmem [#allocation6], %s1556_s15 }
 0x3d8   : > { %v1860_v6 = vpop.eup %1859 }
 0x3d9   : > { %v652_v7 = vmul.f32 %v1860_v6, %v1856_v60 }
 0x3db   : > { %v653_v8 = vpack.c.bf16 %v652_v7, %v652_v7 }
 0x3dd   : > { %1668 = vmatmul.mubr.msk.bf16.vlgmr.msra.gmra.mrb[0].mxu1 %vm595_vm3, %v653_v8 }
 0x3de   : > { %1679 = vmatprep.mubr.msk.bf16.mxu1 %vm1993_vm1, %v1992_v4 }
 0x441   : > { %v771_v11 = vpop.xlane.xlu0 %770 }
 0x442   : > { %1861 = vrcp.f32 %v771_v11 }
 0x445   : > { %v776_v12 = vpop.permute.xlu0 %775 }
 0x446   : > { %v781_v13 = vsel %vm662_vm4, %v776_v12, 0 }
 0x447   : > { %1678 = vmatpush3.bf16.msra.mxu1 %v781_v13 }
 0x448   : > { %1689 = vmatprep.subr.bf16.mxu1 %v1992_v4 }
 0x449   : > { %v919_v31 = vpop.permute.xlu0 %918 }
 0x44c   : > { %v1862_v14 = vpop.eup %1861 }
 0x44d   : > { %v773_v16 = vmul.f32 %v1862_v14, %v1858_v2 }
 0x44f   : > { %v774_v17 = vpack.c.bf16 %v773_v16, %v773_v16 }
 0x451   : > { %1680 = vmatmul.mubr.msk.bf16.vlgmr.msra.gmra.mrb[4].mxu1 %vm595_vm3, %v774_v17 }
 0x452   : > { %1690 = vmatpush3.bf16.msra.mxu1 %v875_v18  ;;  %1691 = vmatprep.mubr.msk.bf16.mxu1 %vm1993_vm1, %v1992_v4  ;;  %v1195_v18 = vld [vmem:[#allocation3 + $0xc] sm:$0xf] }
 0x453   : > { %1701 = vmatprep.subr.bf16.mxu1 %v1992_v4 }
 0x4b0   : > { %v700_v19 = vpop.f32.mrb[0].mxu1 }
 0x4b1   : > { %v706_v20 = vpack.c.bf16 %v700_v19, %v700_v19  ;;  %v1669_v21 = vpop.f32.mrb[1].mxu1  ;;  %v1200_v19 = vsel %vm662_vm4, %v1195_v18, 0 }
 0x4b2   : > { %v703_v22 = vpop.f32.mrb[2].mxu1 }
 0x4b3   : > { %v1670_v23 = vpop.f32.mrb[3].mxu1  ;;  %1692 = vmatmul.mubr.msk.bf16.vlgmr.msra.gmra.mrb[8].mxu1 %vm595_vm3, %v706_v20 }
 0x4b4   : > { %1703 = vmatprep.mubr.msk.bf16.mxu1 %vm1993_vm1, %v1992_v4 }
 0x524   : > { %v817_v25 = vpop.f32.mrb[4].mxu1 }
 0x525   : > { %v823_v26 = vpack.c.bf16 %v817_v25, %v817_v25  ;;  %v1681_v27 = vpop.f32.mrb[5].mxu1 }
 0x526   : > { %v820_v28 = vpop.f32.mrb[6].mxu1 }
 0x527   : > { %v1682_v30 = vpop.f32.mrb[7].mxu1  ;;  %1686 = vmatmul.mubr.msk.bf16.vlgmr.msra.gmra.mrb[16].mxu0 %vm595_vm3, %v823_v26 }
 0x528   : > { %1696 = vmatpush3.bf16.xpose.msra.mxu0 %v929_v29  ;;  %1697 = vmatprep.mubr.msk.bf16.mxu0 %vm1993_vm1, %v1992_v4 }
 0x529   : > { %1707 = vmatprep.subr.bf16.mxu0 %v1992_v4 }
 0x52f   : > { %1698 = vmatmul.mubr.msk.bf16.vlgmr.msra.gmra.mrb[20].mxu0 %vm595_vm3, %v919_v31 }
 0x530   : > { %1709 = vmatprep.mubr.msk.bf16.mxu0 %vm1993_vm1, %v1992_v4  ;;  %1708 = vmatpush3.bf16.msra.mxu0 %v1037_v62  ;;  %v1849_v62 = vld [vmem:[%s2408_s10 + $0x30] sm:$0xff]  }
 0x531   : > { %1719 = vmatprep.subr.bf16.mxu0 %v1992_v4 }
 0x586   : > { %v911_v32 = vpop.f32.mrb[8].mxu1 }
 0x587   : > { %v1693_v33 = vpop.f32.mrb[9].mxu1 }
 0x588   : > { %v914_v34 = vpop.f32.mrb[10].mxu1 }
 0x589   : > { %v1694_v35 = vpop.f32.mrb[11].mxu1 }
 0x58a   : > { %v1584_v35 = vld [vmem:[%s2404_s6] ss:$0 sm:$0xff] }
 0x5fa   : > { %v865_v36 = vpop.f32.mrb[16].mxu0 }
 0x5fb   : > { %v2255_v37 = vadd.f32 %v911_v32, %v865_v36  ;;  %v1687_v38 = vpop.f32.mrb[17].mxu0 }
 0x5fc   : > { %v868_v40 = vpop.f32.mrb[18].mxu0 }
 0x5fd   : > { %v1688_v41 = vpop.f32.mrb[19].mxu0 }
 0x602   : > { %v965_v42 = vpop.f32.mrb[20].mxu0 }
 0x603   : > { %v1699_v43 = vpop.f32.mrb[21].mxu0  ;;  %v971_v44 = vsel %vm595_vm3, %v965_v42, -inf }
 0x604   : > { %972 = vmax.xlane.f32.xlu0 %v971_v44  ;;  %v968_v45 = vpop.f32.mrb[22].mxu0 }
 0x605   : > { %v1700_v46 = vpop.f32.mrb[23].mxu0  ;;  %v1839_v45 = vld [vmem:[%s2407_s9 + $0x4] ss:$8 sps:$4 sm:$0xff]  }
 0x606   : > { %v1837_v46 = vld [vmem:[%s2407_s9] ss:$8 sps:$4 sm:$0xff]  }
 0x61a   : > { %983 = vrot.lane.b32.xlu0 %v2222_v54, %s1998_s23 }
 0x61e   : > { %1081 = vrot.lane.b32.xlu0 %v2207_v39, %s1997_s26  ;;  %s1467_s26 = sshll.u32 %s406_s24, 4  ;;  %s2352_s26 = int_to_ptr.vmem [resolvable:$true] %s1467_s26 }
 0x61f   : > { %s1905_s28 = scalar_lea.vmem %s2352_s26, 128  ;;  %p1912_p1 = scmp.lt.s32.totalorder %s2352_s26, %s1910_s14 }
 0x620   : > { %p1906_p8 = scmp.ne.s32.totalorder %s2352_s26, %s1905_s28  ;;  %p1913_p3 = scmp.lt.s32.totalorder %s1911_s12, %s1905_s28 }
 0x622   : > { %p1907_p11 = pnand %p1906_p8, %p2426_p10  ;;  %p1914_p5 = por %p1913_p3, %p1912_p1 }
 0x624   : > { %p1908_p13 = pneg %p1907_p11 }
 0x626   : > { %p1915_p6 = pnand %p1914_p5, %p1908_p13 }
 0x691   : > { %v973_v47 = vpop.xlane.xlu0 %972 }
 0x692   : > { %v974_v48 = vsub.f32 %v965_v42, %v973_v47  ;;  %v1840_v47 = vld [vmem:[%s2407_s9 + $0x10] ss:$8 sps:$4 sm:$0xff]  }
 0x694   : > { %v975_v49 = vmul.f32 1.442695, %v974_v48  ;;  %v2001_v48 = vmov 0  }
 0x695   : > { %v984_v50 = vpop.permute.xlu0 %983 }
 0x696   : > { %1863 = vpow2.f32 %v975_v49  ;;  %v989_v51 = vsel %vm662_vm4, %v984_v50, 0 }
 0x697   : > { %1702 = vmatpush3.bf16.msra.mxu1 %v989_v51 }
 0x698   : > { %1713 = vmatprep.subr.bf16.mxu1 %v1992_v4 }
 0x699   : > { %v1082_v60 = vpop.permute.xlu0 %1081 }
 0x6a0   : > { %v1864_v52 = vpop.eup %1863 }
 0x6a1   : > { %v977_v53 = vsel %vm595_vm3, %v1864_v52, 0.0 }
 0x6a2   : > { %978 = vadd.xlane.f32.xlu1 %v977_v53  ;;  %v1585_v53 = vld [vmem:[%s2406_s8] ss:$0 sm:$0xff] }
 0x6b3   : > { %1086 = vrot.lane.b32.xlu1 %v1836_v55, %s1999_s21 }
 0x72f   : > { %v979_v54 = vpop.xlane.xlu1 %978 }
 0x730   : > { %1865 = vrcp.f32 %v979_v54 }
 0x733   : > { %v1087_v57 = vpop.permute.xlu1 %1086 }
 0x734   : > { %v1092_v59 = vsel %vm595_vm3, %v1087_v57, 0  ;;  %v1844_v57 = vld [vmem:[%s2408_s10 + $0x8] sm:$0xff]  }
 0x73a   : > { %v1866_v39 = vpop.eup %1865 }
 0x73b   : > { %v981_v56 = vmul.f32 %v1866_v39, %v1864_v52 }
 0x73d   : > { %v982_v58 = vpack.c.bf16 %v981_v56, %v981_v56  ;;  %v1843_v56 = vld [vmem:[%s2408_s10] sm:$0xff]  }
 0x73f   : > { %1704 = vmatmul.mubr.msk.bf16.vlgmr.msra.gmra.mrb[12].mxu1 %vm595_vm3, %v982_v58  ;;  %v1845_v58 = vld [vmem:[%s2408_s10 + $0x10] sm:$0xff]  }
 0x740   : > { %1714 = vmatpush3.bf16.xpose.msra.mxu1 %v1092_v59  ;;  %1715 = vmatprep.mubr.msk.bf16.mxu1 %vm1993_vm1, %v1992_v4  ;;  %v1846_v59 = vld [vmem:[%s2408_s10 + $0x18] sm:$0xff]  }
 0x741   : > { %1725 = vmatprep.subr.bf16.mxu1 %v1992_v4 }
 0x747   : > { %1716 = vmatmul.mubr.msk.bf16.vlgmr.msra.gmra.mrb[16].mxu1 %vm595_vm3, %v1082_v60  ;;  %v1847_v60 = vld [vmem:[%s2408_s10 + $0x20] sm:$0xff]  }
 0x748   : > { %1727 = vmatprep.mubr.msk.bf16.mxu1 %vm1993_vm1, %v1992_v4  ;;  %1726 = vmatpush3.bf16.msra.mxu1 %v1200_v19 }
 0x749   : > { %1731 = vmatprep.subr.bf16.mxu1 %v1992_v4 }
 0x812   : > { %v1025_v63 = vpop.f32.mrb[12].mxu1 }
 0x813   : > { %v1031_v1 = vpack.c.bf16 %v1025_v63, %v1025_v63  ;;  %v1705_v2 = vpop.f32.mrb[13].mxu1  ;;  %v1850_v63 = vld [vmem:[%s2408_s10 + $0x38] sm:$0xff]  }
 0x814   : > { %v1028_v3 = vpop.f32.mrb[14].mxu1 }
 0x815   : > { %v1706_v5 = vpop.f32.mrb[15].mxu1  ;;  %1710 = vmatmul.mubr.msk.bf16.vlgmr.msra.gmra.mrb[24].mxu0 %vm595_vm3, %v1031_v1 }
 0x816   : > { %1721 = vmatprep.mubr.msk.bf16.mxu0 %vm1993_vm1, %v1992_v4 }
 0x81a   : > { %v1128_v6 = vpop.f32.mrb[16].mxu1 }
 0x81b   : > { %v1717_v7 = vpop.f32.mrb[17].mxu1  ;;  %v1134_v8 = vsel %vm595_vm3, %v1128_v6, -inf }
 0x81c   : > { %1135 = vmax.xlane.f32.xlu0 %v1134_v8  ;;  %v1131_v9 = vpop.f32.mrb[18].mxu1 }
 0x81d   : > { %v1718_v10 = vpop.f32.mrb[19].mxu1 }
 0x832   : > { %1146 = vrot.lane.b32.xlu0 %v1836_v55, %s2000_s30  ;;  %s2350_s30 = scalar_lea.hbm %s2409_s11, %s1601_s25 }
 0x8a9   : > { %v1136_v11 = vpop.xlane.xlu0 %1135 }
 0x8aa   : > { %v1137_v12 = vsub.f32 %v1128_v6, %v1136_v11 }
 0x8ac   : > { %v1138_v13 = vmul.f32 1.442695, %v1137_v12 }
 0x8ad   : > { %v1147_v14 = vpop.permute.xlu0 %1146 }
 0x8ae   : > { %1867 = vpow2.f32 %v1138_v13  ;;  %v1152_v15 = vsel %vm662_vm4, %v1147_v14, 0 }
 0x8af   : > { %1720 = vmatpush3.bf16.msra.mxu0 %v1152_v15 }
 0x8b0   : > { %1296 = vmatprep.subr.bf16.mxu0 %v1839_v45 }
 0x8b8   : > { %v1868_v16 = vpop.eup %1867 }
 0x8b9   : > { %v1140_v17 = vsel %vm595_vm3, %v1868_v16, 0.0 }
 0x8ba   : > { %1141 = vadd.xlane.f32.xlu1 %v1140_v17 }
 0x8e8   : > { %v1073_v20 = vpop.f32.mrb[24].mxu0 }
 0x8e9   : > { %v1079_v21 = vadd.f32 %v1073_v20, %v2255_v37  ;;  %v1711_v22 = vpop.f32.mrb[25].mxu0 }
 0x8ea   : > { %v1076_v23 = vpop.f32.mrb[26].mxu0 }
 0x8eb   : > { %v1712_v24 = vpop.f32.mrb[27].mxu0 }
 0x947   : > { %v1142_v25 = vpop.xlane.xlu1 %1141 }
 0x948   : > { %1869 = vrcp.f32 %v1142_v25 }
 0x952   : > { %v1870_v26 = vpop.eup %1869 }
 0x953   : > { %v1144_v27 = vmul.f32 %v1870_v26, %v1868_v16 }
 0x955   : > { %v1145_v28 = vpack.c.bf16 %v1144_v27, %v1144_v27 }
 0x957   : > { %1722 = vmatmul.mubr.msk.bf16.vlgmr.msra.gmra.mrb[28].mxu0 %vm595_vm3, %v1145_v28 }
 0x958   : > { %1297 = vmatpush1.bf16.msra.mxu0 %v1837_v46  ;;  %1328 = vmatprep.mubr.bf16.mxu0 %v2001_v48 }
 0xa2a   : > { %v1188_v29 = vpop.f32.mrb[28].mxu0 }
 0xa2b   : > { %v1194_v30 = vpack.c.bf16 %v1188_v29, %v1188_v29  ;;  %v1723_v31 = vpop.f32.mrb[29].mxu0 }
 0xa2c   : > { %v1191_v32 = vpop.f32.mrb[30].mxu0 }
 0xa2d   : > { %v1724_v33 = vpop.f32.mrb[31].mxu0  ;;  %1728 = vmatmul.mubr.msk.bf16.vlgmr.msra.gmra.mrb[20].mxu1 %vm595_vm3, %v1194_v30 }
 0xa2e   : > { %1747 = vmatprep.mubr.msk.bf16.mxu1 %vm1993_vm1, %v1992_v4  ;;  %1732 = vmatpush3.bf16.msra.mxu1 %v1843_v56 }
 0xa2f   : > { %1733 = vmatprep.subr.bf16.mxu1 %v1992_v4 }
 0xa32   : > { %1734 = vmatpush3.bf16.msra.mxu1 %v1844_v57 }
 0xa33   : > { %1735 = vmatprep.subr.bf16.mxu1 %v1992_v4 }
 0xa36   : > { %1736 = vmatpush3.bf16.msra.mxu1 %v1845_v58 }
 0xa37   : > { %1737 = vmatprep.subr.bf16.mxu1 %v1992_v4 }
 0xa3a   : > { %1738 = vmatpush3.bf16.msra.mxu1 %v1846_v59 }
 0xa3b   : > { %1739 = vmatprep.subr.bf16.mxu1 %v1992_v4 }
 0xa3e   : > { %1740 = vmatpush3.bf16.msra.mxu1 %v1847_v60 }
 0xa3f   : > { %1741 = vmatprep.subr.bf16.mxu1 %v1992_v4 }
 0xa42   : > { %1742 = vmatpush3.bf16.msra.mxu1 %v1848_v61 }
 0xa43   : > { %1743 = vmatprep.subr.bf16.mxu1 %v1992_v4 }
 0xa46   : > { %1744 = vmatpush3.bf16.msra.mxu1 %v1849_v62 }
 0xa47   : > { %1745 = vmatprep.subr.bf16.mxu1 %v1992_v4 }
 0xa4a   : > { %1746 = vmatpush3.bf16.msra.mxu1 %v1850_v63 }
 0xb00   : > { %v1236_v34 = vpop.f32.mrb[20].mxu1 }
 0xb01   : > { %v1242_v36 = vadd.f32 %v1236_v34, %v1079_v21  ;;  %v1729_v37 = vpop.f32.mrb[21].mxu1 }
 0xb02   : > { %v1239_v38 = vpop.f32.mrb[22].mxu1 }
 0xb03   : > { %v1250_v40 = vadd.f32 %v1584_v35, %v1242_v36  ;;  %v1730_v41 = vpop.f32.mrb[23].mxu1 }
 0xb05   : > { %v2291_v42 = vadd.f32 %v1250_v40, %v2161_v0  ;;  %v1842_v0 = vld [vmem:[%s2407_s9 + $0x14] ss:$8 sps:$4 sm:$0xff]  }
 0xb06   : > { %1298 = vmatprep.subr.bf16.mxu0 %v1842_v0 }
 0xb07   : > { %v1252_v43 = vmul.f32 %v2291_v42, %v2291_v42  ;;  %1299 = vmatpush1.bf16.msra.mxu0 %v1840_v47 }
 0xb09   : > { %v1253_v44 = vsel %vm418_vm0, %v1252_v43, 0.0 }
 0xb0a   : > { %1254 = vadd.xlane.f32.xlu1 %v1253_v44 }
 0xb97   : > { %v1255_v49 = vpop.xlane.xlu1 %1254 }
 0xb98   : > { %v1256_v50 = vmul.f32 0.03125, %v1255_v49 }
 0xb9a   : > { %v1257_v51 = vadd.f32 1e-05, %v1256_v50 }
 0xb9c   : > { %1871 = vrsqrt.f32 %v1257_v51 }
 0xba6   : > { %v1872_v52 = vpop.eup %1871 }
 0xba7   : > { %v1259_v55 = vmul.f32 %v1872_v52, %v2291_v42 }
 0xba9   : > { %v1267_v54 = vmul.f32 %v1585_v53, %v1259_v55 }
 0xbab   : > { %v1268_v39 = vpack.c.bf16 %v1267_v54, %v1267_v54 }
 0xbad   : > { %1590 = vmatmul.mubr.msk.bf16.vlgmr.msra.gmra.mrb[32].mxu0 %vm418_vm0, %v1268_v39 }
 0xc80   : > { %v1330_v1 = vpop.f32.mrb[32].mxu0 }
 0xc81   : > { %v1591_v2 = vmul.f32 -1.442695, %v1330_v1  ;;  %v1332_v3 = vpop.f32.mrb[33].mxu0 }
 0xc82   : > { %v1334_v5 = vpop.f32.mrb[34].mxu0 }
 0xc83   : > { %1873 = vpow2.f32 %v1591_v2  ;;  %v1335_v6 = vpop.f32.mrb[35].mxu0 }
 0xc8d   : > { %v1874_v7 = vpop.eup %1873 }
 0xc8e   : > { %v1340_v8 = vadd.f32 1.0, %v1874_v7 }
 0xc90   : > { %1875 = vrcp.f32 %v1340_v8 }
 0xc9a   : > { %v1876_v9 = vpop.eup %1875 }
 0xc9b   : > { %v1343_v10 = vmul.f32 %v1876_v9, %v1330_v1 }
 0xc9d   : > { %v1344_v11 = vmul.f32 %v1343_v10, %v1332_v3 }
 0xc9f   : > { %v1345_v4 = vpack.c.bf16 %v1344_v11, %v1344_v11 }
 0xca1   : > { %1748 = vmatmul.mubr.bf16.vlgmr.msra.gmra.mrb[24].mxu1 %v1345_v4 }
 0xd74   : > { %v1444_v12 = vpop.f32.mrb[24].mxu1 }
 0xd75   : > { %v1450_v13 = vadd.f32 %v1444_v12, %v2291_v42  ;;  %v1749_v14 = vpop.f32.mrb[25].mxu1 }
 0xd76   : > { %v1447_v15 = vpop.f32.mrb[26].mxu1 }
 0xd77   : > { %v1750_v16 = vpop.f32.mrb[27].mxu1  ;;  %1451 = vst.msk [vmem:[%s406_s24] sm:$0xff] %vm418_vm0, %v1450_v13 }
 0xd78   : > { %1918 = shalt.err (!%p1915_p6)
}
 0xd79   : > { %s1919_s13 = scalar_lea.hbm %s2350_s30, 128  ;;  %s1923_s24 = scalar_lea.hbm %s2409_s11, 256 }
 0xd7a   : > { %p1920_p7 = scmp.ne.s32.totalorder %s2350_s30, %s1919_s13  ;;  %p1924_p0 = scmp.lt.u32.totalorder %s2350_s30, %s2409_s11 }
 0xd7b   : > { %p1925_p2 = scmp.lt.u32.totalorder %s1923_s24, %s1919_s13  ;;  %p1927_p8 = scmp.lt.u32.totalorder %s1919_s13, %s2350_s30 }
 0xd7c   : > { %p1921_p9 = pnand %p1920_p7, %p2426_p10 }
 0xd7d   : > { %p1926_p4 = por %p1925_p2, %p1924_p0 }
 0xd7e   : > { %p1922_p12 = pneg %p1921_p9 }
 0xd7f   : > { %p1928_p11 = por %p1927_p8, %p1926_p4 }
 0xd81   : > { %p1929_p13 = pnand %p1928_p11, %p1922_p12 }
 0xd83   : > { %1932 = shalt.err (!%p1929_p13)
}
 0xd84   : > { %1755 = dma.vmem_to_hbm [thread:$0]  (%p2426_p10), %s2352_s26, 128, %s2350_s30, %s1453_s20  }
 0xd85 PF: > { %p1767_p1 = scmp.ge.s32.totalorder %s1987_s22, 2  ;;  %s1479_s28 = sand.u32 1, %s1967_s17  }
 0xd86   : > { %p2427_p3 = scmp.ne.s32.totalorder %s2419_s29, 0  ;;  %s1480_s16 = scalar_lea.sflag [#allocation5], %s1479_s28 }
 0xd88   : > { %p1762_p5 = pnand %p1767_p1, %p2427_p3 }
 0xd8a   : > { %1962 = dma.done.wait (!%p1762_p5), %s1480_s16, 128  }
 0xd8b   : > { %1964 = vsyncadd (!%p1762_p5), %s1480_s16, 4294967168  ;;  %s25_s22 = sadd.s32 1, %s1987_s22   ;;  %s2428_s27 = sld [smem:[#allocation11_spill]] }
 0xd8c   : > { %p22_p6 = scmp.ge.s32.totalorder %s25_s22, 4   ;;  %s2429_s20 = sld [smem:[#allocation9_spill]] }
 0xd8d   : > { %s2430_s21 = sld [smem:[#allocation10_spill]]  ;;  %s2431_s17 = smov %s1971_s18 }
 0xd8e   : > { %s2432_s18 = smov %s1975_s19  ;;  %24 = sbr.rel (!%p22_p6) target bundleno = 5 (0x5), region = 109 }
 0xd91   : > { %s2433_s19 = smov %s2428_s27 }
 0xd95   :  { %1485 = vsyncpa [#allocation4], 1 }
 0xd96   :  { %1487 = vsyncpa [#allocation4 + $0x1], 1 }
 0xd97   :  { %1488 = vsyncpa [#allocation5], 1 }
 0xd98   :  { %1490 = vsyncpa [#allocation5 + $0x1], 1 }

// kernel: tpu_custom_call.1
= control target key start
LH: loop header
LB: loop body
LE: loop exit
PB: predicated region body
PF: predicated region fallthrough
CT: control target
= control target key end

     0   :  { %16 = vsyncpa [#allocation4], 0  ;;  %s2398_s0 = inlined_call_operand.vmem [shape: f32[2,8,32], index: 0, kind: input, shape index: {}]   ;;  %s2399_s1 = inlined_call_operand.vmem [shape: bf16[32,32], index: 1, kind: input, shape index: {}]   ;;  %s2400_s2 = inlined_call_operand.vmem [shape: f32[1,32], index: 2, kind: input, shape index: {}]   ;;  %s2401_s3 = inlined_call_operand.vmem [shape: bf16[32,64], index: 3, kind: input, shape index: {}]   ;;  %s2402_s4 = inlined_call_operand.vmem [shape: f32[1,64], index: 4, kind: input, shape index: {}]   ;;  %s2403_s5 = inlined_call_operand.hbm [shape: bf16[32,32], index: 5, kind: input, shape index: {}]   ;;  %s2404_s6 = inlined_call_operand.vmem [shape: f32[1,32], index: 6, kind: input, shape index: {}]   ;;  %s2405_s7 = inlined_call_operand.vmem [shape: f32[1,32], index: 7, kind: input, shape index: {}]   ;;  %s2406_s8 = inlined_call_operand.vmem [shape: f32[1,32], index: 8, kind: input, shape index: {}]   ;;  %s2407_s9 = inlined_call_operand.vmem [shape: bf16[32,256], index: 9, kind: input, shape index: {}]   ;;  %s2408_s10 = inlined_call_operand.vmem [shape: bf16[128,32], index: 10, kind: input, shape index: {}]   ;;  %s2409_s11 = inlined_call_operand.hbm [shape: f32[2,8,32], index: 11, kind: output, shape index: {}]  }
   0x1   :  { %17 = vsyncpa [#allocation5], 0 }
   0x2   :  { %19 = vsyncpa [#allocation5 + $0x1], 0  ;;  %s2063_s17 = smov 0   ;;  %s2065_s18 = smov 0  }
   0x3   :  { %s2067_s19 = smov 0   ;;  %s2069_s20 = smov 0  }
   0x4   :  { %s2071_s21 = smov 0   ;;  %s2073_s22 = smov 0  }
   0x5 LB: > { %2416 = sst [smem:[#allocation9_spill]] %s1983_s21  ;;  %s1549_s23 = sadd.s32 4294967295, %s1987_s22   ;;  %s1987_s22 = sphi %s2073_s22, %s25_s22   ;;  %s1983_s21 = sphi %s2071_s21, %s2430_s21   ;;  %s1979_s20 = sphi %s2069_s20, %s2429_s20   ;;  %s1975_s19 = sphi %s2067_s19, %s2433_s19   ;;  %s1971_s18 = sphi %s2065_s18, %s2432_s18   ;;  %s1967_s17 = sphi %s2063_s17, %s2431_s17  }
   0x6   : > { %s1550_s24 = sadd.s32 4294967294, %s1987_s22   ;;  %s37_s25 = sadd.s32 1, %s1983_s21 }
   0x7   : > { %s282_s26 = sadd.s32 1, %s1975_s19  ;;  %p39_p0 = scmp.ge.s32.totalorder %s37_s25, 2 }
   0x8   : > { %p292_p1 = scmp.ne.s32.totalorder %s1975_s19, %s1971_s18  ;;  %p293_p2 = scmp.eq.s32.totalorder %s1549_s23, 1 }
   0x9   : > { %p298_p3 = scmp.ne.s32.totalorder %s1971_s18, %s1967_s17  ;;  %s2435_s25 = smov (%p39_p0, %s37_s25), 0 }
   0xa   : > { %2417 = sst [smem:[#allocation10_spill]] %s2435_s25  ;;  %p2103_p4 = por %p293_p2, %p292_p1 }
   0xb   : > { %p299_p5 = scmp.eq.s32.totalorder %s1550_s24, 1  ;;  %s277_s28 = ssub.s32 %s1983_s21, %s2435_s25 }
   0xc   : > { %s2418_s27 = scalar_select %p2103_p4, 1, 0 }
   0xd   : > { %p1551_p6 = scmp.ge.s32.totalorder %s1987_s22, 1  ;;  %p280_p7 = scmp.eq.s32.totalorder %s277_s28, 0 }
   0xe   : > { %p2110_p8 = por %p299_p5, %p298_p3  ;;  %p306_p9 = scmp.lt.s32.totalorder %s1987_s22, 3 }
   0xf   : > { %s2116_s30 = scalar_select %p280_p7, %s1975_s19, %s282_s26  }
  0x10   : > { %s2419_s29 = scalar_select %p2110_p8, 1, 0 }
  0x11   : > { %2420 = sst [smem:[#allocation11_spill]] %s2116_s30  ;;  %p2118_p10 = pnand %p1551_p6, %p306_p9 }
  0x12   : > { %p2122_p11 = scmp.eq.s32.totalorder %s1549_s23, 0  ;;  %s1989_s14 = smov [#allocation3]  }
  0x13   : > { %s2421_s12 = scalar_select %p2118_p10, 1, 0 }
  0x14   : > { %s2422_s13 = scalar_select %p2122_p11, 1, 0 }
  0x15   : > { %p1757_p12 = pneg %p2118_p10  ;;  %s330_s15 = sshll.u32 %s1989_s14, 4  ;;  %s331_s15 = int_to_ptr.vmem [resolvable:$true] %s330_s15 }
  0x16   : > { %s1877_s28 = scalar_lea.hbm %s2403_s5, 256 }
  0x17   : > { %p2130_p13 = pnand %p2122_p11, %p1757_p12  ;;  %p1878_p0 = scmp.ne.s32.totalorder %s2403_s5, %s1877_s28 }
  0x18   : > { %p1884_p5 = scmp.lt.u32.totalorder %s1877_s28, %s2403_s5 }
  0x19   : > { %p1879_p1 = pneg %p2130_p13 }
  0x1b   : > { %p1880_p2 = pnand %p1879_p1, %p1878_p0 }
  0x1d   : > { %p1881_p3 = pneg %p1880_p2 }
  0x1f   : > { %p1886_p6 = pnand %p1884_p5, %p1881_p3 }
  0x21   : > { %1889 = shalt.err (!%p1886_p6)
}
  0x22   : > { %s1890_s30 = scalar_lea.vmem %s331_s15, 256  ;;  %p1898_p8 = scmp.lt.s32.totalorder %s331_s15, %s331_s15 }
  0x23   : > { %p1891_p7 = scmp.ne.s32.totalorder %s331_s15, %s1890_s30  ;;  %p1899_p4 = scmp.lt.s32.totalorder %s1890_s30, %s1890_s30 }
  0x25   : > { %p1893_p9 = pnand %p1891_p7, %p1879_p1  ;;  %p1900_p11 = por %p1899_p4, %p1898_p8 }
  0x27   : > { %p1894_p12 = pneg %p1893_p9 }
  0x29   : > { %p1901_p10 = pnand %p1900_p11, %p1894_p12 }
  0x2b   : > { %1904 = shalt.err (!%p1901_p10)
}
  0x2c   : > { %s1990_s25 = smov 64   ;;  %s1991_s24 = smov 4  }
  0x2d   : > { %1760 = dma.hbm_to_vmem [thread:$0]  (!%p2130_p13), %s2403_s5, 256, %s331_s15, [#allocation4], %s1990_s25, %s1990_s25, %s1991_s24  }
  0x2e   : > { %p2424_p0 = scmp.ne.s32.totalorder %s2421_s12, 0 }
  0x2f   : > { %p2425_p2 = scmp.ne.s32.totalorder (!%p2424_p0), %s2422_s13, 0 }
  0x30   : > { %368 = sbr.rel (%p2424_p0) target bundleno = 3461 (0xd85), region = 64 }
  0x37   : > { %1958 = dma.done.wait (%p2425_p2), [#allocation4], 256  }
  0x38   : > { %1960 = vsyncadd (%p2425_p2), [#allocation4], 4294967040  ;;  %p407_p4 = scmp.lt.s32.totalorder %s1979_s20, 1  ;;  %vm418_vm0 = vcmask 261120   ;;  %v1829_v3 = vld [vmem:[%s2401_s3] sm:$0xff]   ;;  %v1992_v4 = vmov 0.0  }
  0x39   : > { %1643 = vmatprep.subr.bf16.mxu0 %v1992_v4  ;;  %1665 = vmatprep.subr.bf16.mxu1 %v1992_v4  ;;  %v1830_v5 = vld [vmem:[%s2401_s3 + $0x8] sm:$0xff]   ;;  %vm1993_vm1 = vmmov 0   ;;  %v1558_v13 = vld [vmem:[%s2405_s7] ss:$0 sm:$0xff]  ;;  %vm503_vm2 = vcmask 519168   ;;  %vm595_vm3 = vcmask 64512  }
  0x3a   : > { %s408_s21 = scalar_select %p407_p4, %s1979_s20, 1  ;;  %1644 = vmatpush3.bf16.msra.mxu0 %v1829_v3  ;;  %1647 = vmatprep.mubr.msk.bf16.mxu0 %vm1993_vm1, %v1992_v4  ;;  %v1831_v17 = vld [vmem:[%s2399_s1] sm:$0xff]   ;;  %v1832_v21 = vld [vmem:[%s2399_s1 + $0x8] sm:$0xff]   ;;  %vm662_vm4 = vcmask 1043456  }
  0x3b   : > { %1645 = vmatprep.subr.bf16.mxu0 %v1992_v4  ;;  %1667 = vmatprep.mubr.msk.bf16.mxu1 %vm1993_vm1, %v1992_v4  ;;  %v1559_v23 = vld [vmem:[%s2402_s4] ss:$0 sm:$0xff]  ;;  %s1994_s15 = smov 112   ;;  %s1995_s25 = smov 120  }
  0x3c   : > { %s1557_s30 = sshll.u32 %s408_s21, 3  ;;  %v1564_v30 = vld [vmem:[%s2400_s2] ss:$0 sm:$0xff]  ;;  %s1996_s24 = smov 96  }
  0x3d   : > { %s410_s14 = scalar_lea.vmem %s2398_s0, %s1557_s30  ;;  %s1997_s26 = smov 104  }
  0x3e   : > { %v2161_v0 = vld [vmem:[%s410_s14] sm:$0xff]  ;;  %1646 = vmatpush3.bf16.msra.mxu0 %v1830_v5  ;;  %s1998_s23 = smov 88   ;;  %s1999_s21 = smov 80  }
  0x3f   : > { %v417_v1 = vmul.f32 %v2161_v0, %v2161_v0  ;;  %1651 = vmatprep.subr.bf16.mxu0 %v1992_v4  ;;  %s2000_s30 = smov 72   ;;  %s404_s13 = sand.u32 1, %s1971_s18  }
  0x40   : > { %p2426_p10 = scmp.ne.s32.totalorder %s2418_s27, 0  ;;  %s2002_s16 = smov [#allocation6]  }
  0x41   : > { %v419_v2 = vsel %vm418_vm0, %v417_v1, 0.0  ;;  %s1909_s14 = sshll.u32 %s2002_s16, 4  ;;  %s1910_s14 = int_to_ptr.vmem [resolvable:$false] %s1909_s14 }
  0x42   : > { %420 = vadd.xlane.f32.xlu0 %v419_v2  ;;  %s1911_s12 = scalar_lea.vmem %s1910_s14, 256 }
  0x46   : > { %511 = vadd.xlane.f32.xlu0 %v419_v2 }
  0xcf   : > { %v421_v6 = vpop.xlane.xlu0 %420 }
  0xd0   : > { %v423_v7 = vmul.f32 0.03125, %v421_v6 }
  0xd2   : > { %v424_v8 = vadd.f32 1e-05, %v423_v7 }
  0xd3   : > { %v512_v9 = vpop.xlane.xlu0 %511 }
  0xd4   : > { %1851 = vrsqrt.f32 %v424_v8  ;;  %v514_v10 = vmul.f32 0.03125, %v512_v9  ;;  %v824_v9 = vld [vmem:[#allocation3 + $0x4] sm:$0xf] }
  0xd6   : > { %v515_v11 = vadd.f32 1e-05, %v514_v10  ;;  %v829_v10 = vsel %vm662_vm4, %v824_v9, 0 }
  0xd8   : > { %1853 = vrsqrt.f32 %v515_v11 }
  0xde   : > { %v1852_v12 = vpop.eup %1851 }
  0xdf   : > { %v426_v14 = vmul.f32 %v1852_v12, %v2161_v0 }
  0xe1   : > { %v434_v15 = vmul.f32 %v1558_v13, %v426_v14 }
  0xe2   : > { %v1854_v16 = vpop.eup %1853 }
  0xe3   : > { %v517_v18 = vmul.f32 %v1854_v16, %v2161_v0  ;;  %v435_v19 = vpack.c.bf16 %v434_v15, %v434_v15  ;;  %v707_v15 = vld [vmem:[#allocation3] sm:$0xf] }
  0xe5   : > { %1648 = vmatmul.mubr.msk.bf16.vlgmr.msra.gmra.mrb[0].mxu0 %vm418_vm0, %v435_v19  ;;  %v525_v20 = vmul.f32 %v1558_v13, %v517_v18  ;;  %v875_v18 = vsel %vm662_vm4, %v707_v15, 0 }
  0xe6   : > { %1652 = vmatpush3.bf16.msra.mxu0 %v1831_v17  ;;  %1655 = vmatprep.mubr.msk.bf16.mxu0 %vm1993_vm1, %v1992_v4 }
  0xe7   : > { %1653 = vmatprep.subr.bf16.mxu0 %v1992_v4  ;;  %v526_v22 = vpack.c.bf16 %v525_v20, %v525_v20 }
  0xea   : > { %1654 = vmatpush3.bf16.msra.mxu0 %v1832_v21 }
  0xeb   : > { %1659 = vmatprep.subr.bf16.mxu0 %v1992_v4 }
  0xed   : > { %1656 = vmatmul.mubr.msk.bf16.vlgmr.msra.gmra.mrb[4].mxu0 %vm418_vm0, %v526_v22 }
  0xee   : > { %1661 = vmatprep.mubr.msk.bf16.mxu0 %vm1993_vm1, %v1992_v4 }
 0x1b8   : > { %v496_v24 = vpop.f32.mrb[0].mxu0 }
 0x1b9   : > { %v497_v25 = vadd.f32 %v1559_v23, %v496_v24  ;;  %v1649_v26 = vpop.f32.mrb[1].mxu0 }
 0x1ba   : > { %v499_v27 = vpop.f32.mrb[2].mxu0 }
 0x1bb   : > { %v502_v28 = vpack.c.bf16 %v497_v25, %v497_v25  ;;  %v1650_v29 = vpop.f32.mrb[3].mxu0 }
 0x1bd   : > { %504 = vst.msk [vmem:[#allocation2] sm:$0xf] %vm503_vm2, %v502_v28 }
 0x1c0   : > { %v587_v31 = vpop.f32.mrb[4].mxu0 }
 0x1c1   : > { %v1657_v32 = vpop.f32.mrb[5].mxu0  ;;  %v588_v33 = vadd.f32 %v1564_v30, %v587_v31 }
 0x1c2   : > { %v590_v34 = vpop.f32.mrb[6].mxu0 }
 0x1c3   : > { %v1658_v35 = vpop.f32.mrb[7].mxu0  ;;  %v2207_v39 = vpack.c.bf16 %v588_v33, %v588_v33 }
 0x1c4   : > { %v594_v36 = vld [vmem:[#allocation2] sm:$0xf] }
 0x1c5   : > { %v1833_v37 = vld [vmem:[#allocation2] ss:$0 sps:$4 sm:$0xff]   ;;  %v600_v38 = vsel %vm595_vm3, %v594_v36, 0  ;;  %v1569_v48 = vcombine.low %v594_v36, %v594_v36 }
 0x1c6   : > { %1660 = vmatpush3.bf16.xpose.msra.mxu0 %v600_v38  ;;  %715 = vrot.lane.b32.xlu1 %v1833_v37, %s1994_s15  ;;  %v2222_v54 = vld [vmem:[#allocation2] ss:$0 sps:$4 sm:$0xff]  }
 0x1c7   : > { %1671 = vmatprep.subr.bf16.mxu0 %v1992_v4 }
 0x1ca   : > { %710 = vrot.lane.b32.xlu1 %v2207_v39, %s1995_s25 }
 0x1cd   : > { %1662 = vmatmul.mubr.msk.bf16.vlgmr.msra.gmra.mrb[8].mxu0 %vm595_vm3, %v2207_v39 }
 0x1ce   : > { %1673 = vmatprep.mubr.msk.bf16.mxu0 %vm1993_vm1, %v1992_v4 }
 0x238   : > { %v716_v40 = vpop.permute.xlu1 %715 }
 0x239   : > { %v721_v41 = vsel %vm595_vm3, %v716_v40, 0 }
 0x23a   : > { %1672 = vmatpush3.bf16.xpose.msra.mxu0 %v721_v41 }
 0x23b   : > { %1683 = vmatprep.subr.bf16.mxu0 %v1992_v4 }
 0x23c   : > { %v711_v42 = vpop.permute.xlu1 %710 }
 0x241   : > { %1674 = vmatmul.mubr.msk.bf16.vlgmr.msra.gmra.mrb[12].mxu0 %vm595_vm3, %v711_v42 }
 0x242   : > { %1685 = vmatprep.mubr.msk.bf16.mxu0 %vm1993_vm1, %v1992_v4  ;;  %1684 = vmatpush3.bf16.msra.mxu0 %v829_v10 }
 0x243   : > { %1695 = vmatprep.subr.bf16.mxu0 %v1992_v4 }
 0x2a0   : > { %v636_v43 = vpop.f32.mrb[8].mxu0 }
 0x2a1   : > { %v1663_v44 = vpop.f32.mrb[9].mxu0  ;;  %v642_v45 = vsel %vm595_vm3, %v636_v43, -inf }
 0x2a2   : > { %643 = vmax.xlane.f32.xlu0 %v642_v45  ;;  %v639_v46 = vpop.f32.mrb[10].mxu0 }
 0x2a3   : > { %v1664_v47 = vpop.f32.mrb[11].mxu0 }
 0x2b8   : > { %657 = vrot.lane.b32.xlu0 %v1569_v48, %s1995_s25  ;;  %s1601_s25 = sshll.u32 %s1979_s20, 7  ;;  %s1453_s20 = scalar_lea.sflag [#allocation5], %s404_s13 }
 0x314   : > { %v757_v49 = vpop.f32.mrb[12].mxu0 }
 0x315   : > { %v1675_v50 = vpop.f32.mrb[13].mxu0  ;;  %v763_v51 = vsel %vm595_vm3, %v757_v49, -inf }
 0x316   : > { %764 = vmax.xlane.f32.xlu1 %v763_v51  ;;  %v760_v52 = vpop.f32.mrb[14].mxu0 }
 0x317   : > { %v1676_v53 = vpop.f32.mrb[15].mxu0 }
 0x327   : > { %923 = vrot.lane.b32.xlu1 %v2222_v54, %s1996_s24 }
 0x32f   : > { %v644_v55 = vpop.xlane.xlu0 %643 }
 0x330   : > { %v645_v56 = vsub.f32 %v636_v43, %v644_v55  ;;  %v1836_v55 = vld [vmem:[#allocation2] ss:$0 sps:$4 sm:$0xff]  }
 0x332   : > { %v646_v57 = vmul.f32 1.442695, %v645_v56 }
 0x333   : > { %v658_v58 = vpop.permute.xlu0 %657 }
 0x334   : > { %1855 = vpow2.f32 %v646_v57  ;;  %v664_v59 = vsel %vm662_vm4, %v658_v58, 0 }
 0x335   : > { %1666 = vmatpush3.bf16.msra.mxu1 %v664_v59 }
 0x336   : > { %1677 = vmatprep.subr.bf16.mxu1 %v1992_v4 }
 0x33e   : > { %v1856_v60 = vpop.eup %1855 }
 0x33f   : > { %v648_v61 = vsel %vm595_vm3, %v1856_v60, 0.0 }
 0x340   : > { %649 = vadd.xlane.f32.xlu0 %v648_v61  ;;  %v1032_v61 = vld [vmem:[#allocation3 + $0x8] sm:$0xf] }
 0x3a3   : > { %v765_v62 = vpop.xlane.xlu1 %764 }
 0x3a4   : > { %v766_v63 = vsub.f32 %v757_v49, %v765_v62  ;;  %v1037_v62 = vsel %vm662_vm4, %v1032_v61, 0  ;;  %v1848_v61 = vld [vmem:[%s2408_s10 + $0x28] sm:$0xff]  }
 0x3a6   : > { %v767_v1 = vmul.f32 1.442695, %v766_v63 }
 0x3a7   : > { %v924_v24 = vpop.permute.xlu1 %923 }
 0x3a8   : > { %1857 = vpow2.f32 %v767_v1  ;;  %v929_v29 = vsel %vm595_vm3, %v924_v24, 0 }
 0x3b2   : > { %v1858_v2 = vpop.eup %1857 }
 0x3b3   : > { %v769_v3 = vsel %vm595_vm3, %v1858_v2, 0.0 }
 0x3b4   : > { %770 = vadd.xlane.f32.xlu0 %v769_v3 }
 0x3ca   : > { %775 = vrot.lane.b32.xlu0 %v1833_v37, %s1997_s26 }
 0x3cd   : > { %v650_v5 = vpop.xlane.xlu0 %649 }
 0x3ce   : > { %1859 = vrcp.f32 %v650_v5  ;;  %918 = vrot.lane.b32.xlu0 %v2207_v39, %s1994_s15  ;;  %s1556_s15 = sshll.u32 %s404_s13, 3 }
 0x3cf   : > { %s406_s24 = scalar_lea.vmem [#allocation6], %s1556_s15 }
 0x3d8   : > { %v1860_v6 = vpop.eup %1859 }
 0x3d9   : > { %v652_v7 = vmul.f32 %v1860_v6, %v1856_v60 }
 0x3db   : > { %v653_v8 = vpack.c.bf16 %v652_v7, %v652_v7 }
 0x3dd   : > { %1668 = vmatmul.mubr.msk.bf16.vlgmr.msra.gmra.mrb[0].mxu1 %vm595_vm3, %v653_v8 }
 0x3de   : > { %1679 = vmatprep.mubr.msk.bf16.mxu1 %vm1993_vm1, %v1992_v4 }
 0x441   : > { %v771_v11 = vpop.xlane.xlu0 %770 }
 0x442   : > { %1861 = vrcp.f32 %v771_v11 }
 0x445   : > { %v776_v12 = vpop.permute.xlu0 %775 }
 0x446   : > { %v781_v13 = vsel %vm662_vm4, %v776_v12, 0 }
 0x447   : > { %1678 = vmatpush3.bf16.msra.mxu1 %v781_v13 }
 0x448   : > { %1689 = vmatprep.subr.bf16.mxu1 %v1992_v4 }
 0x449   : > { %v919_v31 = vpop.permute.xlu0 %918 }
 0x44c   : > { %v1862_v14 = vpop.eup %1861 }
 0x44d   : > { %v773_v16 = vmul.f32 %v1862_v14, %v1858_v2 }
 0x44f   : > { %v774_v17 = vpack.c.bf16 %v773_v16, %v773_v16 }
 0x451   : > { %1680 = vmatmul.mubr.msk.bf16.vlgmr.msra.gmra.mrb[4].mxu1 %vm595_vm3, %v774_v17 }
 0x452   : > { %1690 = vmatpush3.bf16.msra.mxu1 %v875_v18  ;;  %1691 = vmatprep.mubr.msk.bf16.mxu1 %vm1993_vm1, %v1992_v4  ;;  %v1195_v18 = vld [vmem:[#allocation3 + $0xc] sm:$0xf] }
 0x453   : > { %1701 = vmatprep.subr.bf16.mxu1 %v1992_v4 }
 0x4b0   : > { %v700_v19 = vpop.f32.mrb[0].mxu1 }
 0x4b1   : > { %v706_v20 = vpack.c.bf16 %v700_v19, %v700_v19  ;;  %v1669_v21 = vpop.f32.mrb[1].mxu1  ;;  %v1200_v19 = vsel %vm662_vm4, %v1195_v18, 0 }
 0x4b2   : > { %v703_v22 = vpop.f32.mrb[2].mxu1 }
 0x4b3   : > { %v1670_v23 = vpop.f32.mrb[3].mxu1  ;;  %1692 = vmatmul.mubr.msk.bf16.vlgmr.msra.gmra.mrb[8].mxu1 %vm595_vm3, %v706_v20 }
 0x4b4   : > { %1703 = vmatprep.mubr.msk.bf16.mxu1 %vm1993_vm1, %v1992_v4 }
 0x524   : > { %v817_v25 = vpop.f32.mrb[4].mxu1 }
 0x525   : > { %v823_v26 = vpack.c.bf16 %v817_v25, %v817_v25  ;;  %v1681_v27 = vpop.f32.mrb[5].mxu1 }
 0x526   : > { %v820_v28 = vpop.f32.mrb[6].mxu1 }
 0x527   : > { %v1682_v30 = vpop.f32.mrb[7].mxu1  ;;  %1686 = vmatmul.mubr.msk.bf16.vlgmr.msra.gmra.mrb[16].mxu0 %vm595_vm3, %v823_v26 }
 0x528   : > { %1696 = vmatpush3.bf16.xpose.msra.mxu0 %v929_v29  ;;  %1697 = vmatprep.mubr.msk.bf16.mxu0 %vm1993_vm1, %v1992_v4 }
 0x529   : > { %1707 = vmatprep.subr.bf16.mxu0 %v1992_v4 }
 0x52f   : > { %1698 = vmatmul.mubr.msk.bf16.vlgmr.msra.gmra.mrb[20].mxu0 %vm595_vm3, %v919_v31 }
 0x530   : > { %1709 = vmatprep.mubr.msk.bf16.mxu0 %vm1993_vm1, %v1992_v4  ;;  %1708 = vmatpush3.bf16.msra.mxu0 %v1037_v62  ;;  %v1849_v62 = vld [vmem:[%s2408_s10 + $0x30] sm:$0xff]  }
 0x531   : > { %1719 = vmatprep.subr.bf16.mxu0 %v1992_v4 }
 0x586   : > { %v911_v32 = vpop.f32.mrb[8].mxu1 }
 0x587   : > { %v1693_v33 = vpop.f32.mrb[9].mxu1 }
 0x588   : > { %v914_v34 = vpop.f32.mrb[10].mxu1 }
 0x589   : > { %v1694_v35 = vpop.f32.mrb[11].mxu1 }
 0x58a   : > { %v1584_v35 = vld [vmem:[%s2404_s6] ss:$0 sm:$0xff] }
 0x5fa   : > { %v865_v36 = vpop.f32.mrb[16].mxu0 }
 0x5fb   : > { %v2255_v37 = vadd.f32 %v911_v32, %v865_v36  ;;  %v1687_v38 = vpop.f32.mrb[17].mxu0 }
 0x5fc   : > { %v868_v40 = vpop.f32.mrb[18].mxu0 }
 0x5fd   : > { %v1688_v41 = vpop.f32.mrb[19].mxu0 }
 0x602   : > { %v965_v42 = vpop.f32.mrb[20].mxu0 }
 0x603   : > { %v1699_v43 = vpop.f32.mrb[21].mxu0  ;;  %v971_v44 = vsel %vm595_vm3, %v965_v42, -inf }
 0x604   : > { %972 = vmax.xlane.f32.xlu0 %v971_v44  ;;  %v968_v45 = vpop.f32.mrb[22].mxu0 }
 0x605   : > { %v1700_v46 = vpop.f32.mrb[23].mxu0  ;;  %v1839_v45 = vld [vmem:[%s2407_s9 + $0x4] ss:$8 sps:$4 sm:$0xff]  }
 0x606   : > { %v1837_v46 = vld [vmem:[%s2407_s9] ss:$8 sps:$4 sm:$0xff]  }
 0x61a   : > { %983 = vrot.lane.b32.xlu0 %v2222_v54, %s1998_s23 }
 0x61e   : > { %1081 = vrot.lane.b32.xlu0 %v2207_v39, %s1997_s26  ;;  %s1467_s26 = sshll.u32 %s406_s24, 4  ;;  %s2352_s26 = int_to_ptr.vmem [resolvable:$true] %s1467_s26 }
 0x61f   : > { %s1905_s28 = scalar_lea.vmem %s2352_s26, 128  ;;  %p1912_p1 = scmp.lt.s32.totalorder %s2352_s26, %s1910_s14 }
 0x620   : > { %p1906_p8 = scmp.ne.s32.totalorder %s2352_s26, %s1905_s28  ;;  %p1913_p3 = scmp.lt.s32.totalorder %s1911_s12, %s1905_s28 }
 0x622   : > { %p1907_p11 = pnand %p1906_p8, %p2426_p10  ;;  %p1914_p5 = por %p1913_p3, %p1912_p1 }
 0x624   : > { %p1908_p13 = pneg %p1907_p11 }
 0x626   : > { %p1915_p6 = pnand %p1914_p5, %p1908_p13 }
 0x691   : > { %v973_v47 = vpop.xlane.xlu0 %972 }
 0x692   : > { %v974_v48 = vsub.f32 %v965_v42, %v973_v47  ;;  %v1840_v47 = vld [vmem:[%s2407_s9 + $0x10] ss:$8 sps:$4 sm:$0xff]  }
 0x694   : > { %v975_v49 = vmul.f32 1.442695, %v974_v48  ;;  %v2001_v48 = vmov 0  }
 0x695   : > { %v984_v50 = vpop.permute.xlu0 %983 }
 0x696   : > { %1863 = vpow2.f32 %v975_v49  ;;  %v989_v51 = vsel %vm662_vm4, %v984_v50, 0 }
 0x697   : > { %1702 = vmatpush3.bf16.msra.mxu1 %v989_v51 }
 0x698   : > { %1713 = vmatprep.subr.bf16.mxu1 %v1992_v4 }
 0x699   : > { %v1082_v60 = vpop.permute.xlu0 %1081 }
 0x6a0   : > { %v1864_v52 = vpop.eup %1863 }
 0x6a1   : > { %v977_v53 = vsel %vm595_vm3, %v1864_v52, 0.0 }
 0x6a2   : > { %978 = vadd.xlane.f32.xlu1 %v977_v53  ;;  %v1585_v53 = vld [vmem:[%s2406_s8] ss:$0 sm:$0xff] }
 0x6b3   : > { %1086 = vrot.lane.b32.xlu1 %v1836_v55, %s1999_s21 }
 0x72f   : > { %v979_v54 = vpop.xlane.xlu1 %978 }
 0x730   : > { %1865 = vrcp.f32 %v979_v54 }
 0x733   : > { %v1087_v57 = vpop.permute.xlu1 %1086 }
 0x734   : > { %v1092_v59 = vsel %vm595_vm3, %v1087_v57, 0  ;;  %v1844_v57 = vld [vmem:[%s2408_s10 + $0x8] sm:$0xff]  }
 0x73a   : > { %v1866_v39 = vpop.eup %1865 }
 0x73b   : > { %v981_v56 = vmul.f32 %v1866_v39, %v1864_v52 }
 0x73d   : > { %v982_v58 = vpack.c.bf16 %v981_v56, %v981_v56  ;;  %v1843_v56 = vld [vmem:[%s2408_s10] sm:$0xff]  }
 0x73f   : > { %1704 = vmatmul.mubr.msk.bf16.vlgmr.msra.gmra.mrb[12].mxu1 %vm595_vm3, %v982_v58  ;;  %v1845_v58 = vld [vmem:[%s2408_s10 + $0x10] sm:$0xff]  }
 0x740   : > { %1714 = vmatpush3.bf16.xpose.msra.mxu1 %v1092_v59  ;;  %1715 = vmatprep.mubr.msk.bf16.mxu1 %vm1993_vm1, %v1992_v4  ;;  %v1846_v59 = vld [vmem:[%s2408_s10 + $0x18] sm:$0xff]  }
 0x741   : > { %1725 = vmatprep.subr.bf16.mxu1 %v1992_v4 }
 0x747   : > { %1716 = vmatmul.mubr.msk.bf16.vlgmr.msra.gmra.mrb[16].mxu1 %vm595_vm3, %v1082_v60  ;;  %v1847_v60 = vld [vmem:[%s2408_s10 + $0x20] sm:$0xff]  }
 0x748   : > { %1727 = vmatprep.mubr.msk.bf16.mxu1 %vm1993_vm1, %v1992_v4  ;;  %1726 = vmatpush3.bf16.msra.mxu1 %v1200_v19 }
 0x749   : > { %1731 = vmatprep.subr.bf16.mxu1 %v1992_v4 }
 0x812   : > { %v1025_v63 = vpop.f32.mrb[12].mxu1 }
 0x813   : > { %v1031_v1 = vpack.c.bf16 %v1025_v63, %v1025_v63  ;;  %v1705_v2 = vpop.f32.mrb[13].mxu1  ;;  %v1850_v63 = vld [vmem:[%s2408_s10 + $0x38] sm:$0xff]  }
 0x814   : > { %v1028_v3 = vpop.f32.mrb[14].mxu1 }
 0x815   : > { %v1706_v5 = vpop.f32.mrb[15].mxu1  ;;  %1710 = vmatmul.mubr.msk.bf16.vlgmr.msra.gmra.mrb[24].mxu0 %vm595_vm3, %v1031_v1 }
 0x816   : > { %1721 = vmatprep.mubr.msk.bf16.mxu0 %vm1993_vm1, %v1992_v4 }
 0x81a   : > { %v1128_v6 = vpop.f32.mrb[16].mxu1 }
 0x81b   : > { %v1717_v7 = vpop.f32.mrb[17].mxu1  ;;  %v1134_v8 = vsel %vm595_vm3, %v1128_v6, -inf }
 0x81c   : > { %1135 = vmax.xlane.f32.xlu0 %v1134_v8  ;;  %v1131_v9 = vpop.f32.mrb[18].mxu1 }
 0x81d   : > { %v1718_v10 = vpop.f32.mrb[19].mxu1 }
 0x832   : > { %1146 = vrot.lane.b32.xlu0 %v1836_v55, %s2000_s30  ;;  %s2350_s30 = scalar_lea.hbm %s2409_s11, %s1601_s25 }
 0x8a9   : > { %v1136_v11 = vpop.xlane.xlu0 %1135 }
 0x8aa   : > { %v1137_v12 = vsub.f32 %v1128_v6, %v1136_v11 }
 0x8ac   : > { %v1138_v13 = vmul.f32 1.442695, %v1137_v12 }
 0x8ad   : > { %v1147_v14 = vpop.permute.xlu0 %1146 }
 0x8ae   : > { %1867 = vpow2.f32 %v1138_v13  ;;  %v1152_v15 = vsel %vm662_vm4, %v1147_v14, 0 }
 0x8af   : > { %1720 = vmatpush3.bf16.msra.mxu0 %v1152_v15 }
 0x8b0   : > { %1296 = vmatprep.subr.bf16.mxu0 %v1839_v45 }
 0x8b8   : > { %v1868_v16 = vpop.eup %1867 }
 0x8b9   : > { %v1140_v17 = vsel %vm595_vm3, %v1868_v16, 0.0 }
 0x8ba   : > { %1141 = vadd.xlane.f32.xlu1 %v1140_v17 }
 0x8e8   : > { %v1073_v20 = vpop.f32.mrb[24].mxu0 }
 0x8e9   : > { %v1079_v21 = vadd.f32 %v1073_v20, %v2255_v37  ;;  %v1711_v22 = vpop.f32.mrb[25].mxu0 }
 0x8ea   : > { %v1076_v23 = vpop.f32.mrb[26].mxu0 }
 0x8eb   : > { %v1712_v24 = vpop.f32.mrb[27].mxu0 }
 0x947   : > { %v1142_v25 = vpop.xlane.xlu1 %1141 }
 0x948   : > { %1869 = vrcp.f32 %v1142_v25 }
 0x952   : > { %v1870_v26 = vpop.eup %1869 }
 0x953   : > { %v1144_v27 = vmul.f32 %v1870_v26, %v1868_v16 }
 0x955   : > { %v1145_v28 = vpack.c.bf16 %v1144_v27, %v1144_v27 }
 0x957   : > { %1722 = vmatmul.mubr.msk.bf16.vlgmr.msra.gmra.mrb[28].mxu0 %vm595_vm3, %v1145_v28 }
 0x958   : > { %1297 = vmatpush1.bf16.msra.mxu0 %v1837_v46  ;;  %1328 = vmatprep.mubr.bf16.mxu0 %v2001_v48 }
 0xa2a   : > { %v1188_v29 = vpop.f32.mrb[28].mxu0 }
 0xa2b   : > { %v1194_v30 = vpack.c.bf16 %v1188_v29, %v1188_v29  ;;  %v1723_v31 = vpop.f32.mrb[29].mxu0 }
 0xa2c   : > { %v1191_v32 = vpop.f32.mrb[30].mxu0 }
 0xa2d   : > { %v1724_v33 = vpop.f32.mrb[31].mxu0  ;;  %1728 = vmatmul.mubr.msk.bf16.vlgmr.msra.gmra.mrb[20].mxu1 %vm595_vm3, %v1194_v30 }
 0xa2e   : > { %1747 = vmatprep.mubr.msk.bf16.mxu1 %vm1993_vm1, %v1992_v4  ;;  %1732 = vmatpush3.bf16.msra.mxu1 %v1843_v56 }
 0xa2f   : > { %1733 = vmatprep.subr.bf16.mxu1 %v1992_v4 }
 0xa32   : > { %1734 = vmatpush3.bf16.msra.mxu1 %v1844_v57 }
 0xa33   : > { %1735 = vmatprep.subr.bf16.mxu1 %v1992_v4 }
 0xa36   : > { %1736 = vmatpush3.bf16.msra.mxu1 %v1845_v58 }
 0xa37   : > { %1737 = vmatprep.subr.bf16.mxu1 %v1992_v4 }
 0xa3a   : > { %1738 = vmatpush3.bf16.msra.mxu1 %v1846_v59 }
 0xa3b   : > { %1739 = vmatprep.subr.bf16.mxu1 %v1992_v4 }
 0xa3e   : > { %1740 = vmatpush3.bf16.msra.mxu1 %v1847_v60 }
 0xa3f   : > { %1741 = vmatprep.subr.bf16.mxu1 %v1992_v4 }
 0xa42   : > { %1742 = vmatpush3.bf16.msra.mxu1 %v1848_v61 }
 0xa43   : > { %1743 = vmatprep.subr.bf16.mxu1 %v1992_v4 }
 0xa46   : > { %1744 = vmatpush3.bf16.msra.mxu1 %v1849_v62 }
 0xa47   : > { %1745 = vmatprep.subr.bf16.mxu1 %v1992_v4 }
 0xa4a   : > { %1746 = vmatpush3.bf16.msra.mxu1 %v1850_v63 }
 0xb00   : > { %v1236_v34 = vpop.f32.mrb[20].mxu1 }
 0xb01   : > { %v1242_v36 = vadd.f32 %v1236_v34, %v1079_v21  ;;  %v1729_v37 = vpop.f32.mrb[21].mxu1 }
 0xb02   : > { %v1239_v38 = vpop.f32.mrb[22].mxu1 }
 0xb03   : > { %v1250_v40 = vadd.f32 %v1584_v35, %v1242_v36  ;;  %v1730_v41 = vpop.f32.mrb[23].mxu1 }
 0xb05   : > { %v2291_v42 = vadd.f32 %v1250_v40, %v2161_v0  ;;  %v1842_v0 = vld [vmem:[%s2407_s9 + $0x14] ss:$8 sps:$4 sm:$0xff]  }
 0xb06   : > { %1298 = vmatprep.subr.bf16.mxu0 %v1842_v0 }
 0xb07   : > { %v1252_v43 = vmul.f32 %v2291_v42, %v2291_v42  ;;  %1299 = vmatpush1.bf16.msra.mxu0 %v1840_v47 }
 0xb09   : > { %v1253_v44 = vsel %vm418_vm0, %v1252_v43, 0.0 }
 0xb0a   : > { %1254 = vadd.xlane.f32.xlu1 %v1253_v44 }
 0xb97   : > { %v1255_v49 = vpop.xlane.xlu1 %1254 }
 0xb98   : > { %v1256_v50 = vmul.f32 0.03125, %v1255_v49 }
 0xb9a   : > { %v1257_v51 = vadd.f32 1e-05, %v1256_v50 }
 0xb9c   : > { %1871 = vrsqrt.f32 %v1257_v51 }
 0xba6   : > { %v1872_v52 = vpop.eup %1871 }
 0xba7   : > { %v1259_v55 = vmul.f32 %v1872_v52, %v2291_v42 }
 0xba9   : > { %v1267_v54 = vmul.f32 %v1585_v53, %v1259_v55 }
 0xbab   : > { %v1268_v39 = vpack.c.bf16 %v1267_v54, %v1267_v54 }
 0xbad   : > { %1590 = vmatmul.mubr.msk.bf16.vlgmr.msra.gmra.mrb[32].mxu0 %vm418_vm0, %v1268_v39 }
 0xc80   : > { %v1330_v1 = vpop.f32.mrb[32].mxu0 }
 0xc81   : > { %v1591_v2 = vmul.f32 -1.442695, %v1330_v1  ;;  %v1332_v3 = vpop.f32.mrb[33].mxu0 }
 0xc82   : > { %v1334_v5 = vpop.f32.mrb[34].mxu0 }
 0xc83   : > { %1873 = vpow2.f32 %v1591_v2  ;;  %v1335_v6 = vpop.f32.mrb[35].mxu0 }
 0xc8d   : > { %v1874_v7 = vpop.eup %1873 }
 0xc8e   : > { %v1340_v8 = vadd.f32 1.0, %v1874_v7 }
 0xc90   : > { %1875 = vrcp.f32 %v1340_v8 }
 0xc9a   : > { %v1876_v9 = vpop.eup %1875 }
 0xc9b   : > { %v1343_v10 = vmul.f32 %v1876_v9, %v1330_v1 }
 0xc9d   : > { %v1344_v11 = vmul.f32 %v1343_v10, %v1332_v3 }
 0xc9f   : > { %v1345_v4 = vpack.c.bf16 %v1344_v11, %v1344_v11 }
 0xca1   : > { %1748 = vmatmul.mubr.bf16.vlgmr.msra.gmra.mrb[24].mxu1 %v1345_v4 }
 0xd74   : > { %v1444_v12 = vpop.f32.mrb[24].mxu1 }
 0xd75   : > { %v1450_v13 = vadd.f32 %v1444_v12, %v2291_v42  ;;  %v1749_v14 = vpop.f32.mrb[25].mxu1 }
 0xd76   : > { %v1447_v15 = vpop.f32.mrb[26].mxu1 }
 0xd77   : > { %v1750_v16 = vpop.f32.mrb[27].mxu1  ;;  %1451 = vst.msk [vmem:[%s406_s24] sm:$0xff] %vm418_vm0, %v1450_v13 }
 0xd78   : > { %1918 = shalt.err (!%p1915_p6)
}
 0xd79   : > { %s1919_s13 = scalar_lea.hbm %s2350_s30, 128  ;;  %s1923_s24 = scalar_lea.hbm %s2409_s11, 256 }
 0xd7a   : > { %p1920_p7 = scmp.ne.s32.totalorder %s2350_s30, %s1919_s13  ;;  %p1924_p0 = scmp.lt.u32.totalorder %s2350_s30, %s2409_s11 }
 0xd7b   : > { %p1925_p2 = scmp.lt.u32.totalorder %s1923_s24, %s1919_s13  ;;  %p1927_p8 = scmp.lt.u32.totalorder %s1919_s13, %s2350_s30 }
 0xd7c   : > { %p1921_p9 = pnand %p1920_p7, %p2426_p10 }
 0xd7d   : > { %p1926_p4 = por %p1925_p2, %p1924_p0 }
 0xd7e   : > { %p1922_p12 = pneg %p1921_p9 }
 0xd7f   : > { %p1928_p11 = por %p1927_p8, %p1926_p4 }
 0xd81   : > { %p1929_p13 = pnand %p1928_p11, %p1922_p12 }
 0xd83   : > { %1932 = shalt.err (!%p1929_p13)
}
 0xd84   : > { %1755 = dma.vmem_to_hbm [thread:$0]  (%p2426_p10), %s2352_s26, 128, %s2350_s30, %s1453_s20  }
 0xd85 PF: > { %p1767_p1 = scmp.ge.s32.totalorder %s1987_s22, 2  ;;  %s1479_s28 = sand.u32 1, %s1967_s17  }
 0xd86   : > { %p2427_p3 = scmp.ne.s32.totalorder %s2419_s29, 0  ;;  %s1480_s16 = scalar_lea.sflag [#allocation5], %s1479_s28 }
 0xd88   : > { %p1762_p5 = pnand %p1767_p1, %p2427_p3 }
 0xd8a   : > { %1962 = dma.done.wait (!%p1762_p5), %s1480_s16, 128  }
 0xd8b   : > { %1964 = vsyncadd (!%p1762_p5), %s1480_s16, 4294967168  ;;  %s25_s22 = sadd.s32 1, %s1987_s22   ;;  %s2428_s27 = sld [smem:[#allocation11_spill]] }
 0xd8c   : > { %p22_p6 = scmp.ge.s32.totalorder %s25_s22, 4   ;;  %s2429_s20 = sld [smem:[#allocation9_spill]] }
 0xd8d   : > { %s2430_s21 = sld [smem:[#allocation10_spill]]  ;;  %s2431_s17 = smov %s1971_s18 }
 0xd8e   : > { %s2432_s18 = smov %s1975_s19  ;;  %24 = sbr.rel (!%p22_p6) target bundleno = 5 (0x5), region = 109 }
 0xd91   : > { %s2433_s19 = smov %s2428_s27 }
 0xd95   :  { %1485 = vsyncpa [#allocation4], 1 }
 0xd96   :  { %1487 = vsyncpa [#allocation4 + $0x1], 1 }
 0xd97   :  { %1488 = vsyncpa [#allocation5], 1 }
 0xd98   :  { %1490 = vsyncpa [#allocation5 + $0x1], 1 }

</bundles_post_ra>
